<compile_context>
chip_gen: v7x
topology: tpu7x:2x2x1
jax: 0.10.0
libtpu: 0.0.40
codegen_flags: <defaults>
</compile_context>

<pallas_src>
import functools

import jax
import jax.numpy as jnp
import numpy as np
from jax import lax
from jax.experimental import pallas as pl
from jax.experimental.pallas import tpu as pltpu


# ----------------------------------------------------------------------------
# Pallas kernel: one batch tile of the whole forward "math"
# ----------------------------------------------------------------------------
def _graphsrrl_kernel(
    qwe_ref,                                   # [L, TB, H] query-word embeddings
    u_ps_ref, u_kg_ref,                        # [TB, H]
    i_ps_ref, i_kg_ref,                        # [TB, H]
    w_ih_ref, w_hh_ref, b_rnn_ref,             # RNN: [H,H], [H,H], [1,H] (b_ih+b_hh)
    gu_wa_ref, gu_wb_ref, gu_b_ref,            # g_u  : [H,H], [H,H], [1,H]
    gi_wa_ref, gi_wb_ref, gi_b_ref,            # g_i
    uq_w1a_ref, uq_w1b_ref, uq_b1_ref, uq_w2_ref, uq_b2_ref,   # ps_mlp_uq
    ui_w1a_ref, ui_w1b_ref, ui_b1_ref, ui_w2_ref, ui_b2_ref,   # ps_mlp_ui
    pr_w1a_ref, pr_w1b_ref, pr_b1_ref, pr_w2t_ref, pr_b2_ref,  # ps_mlp_pred (w2 pre-transposed [1,H])
    out_ref,                                   # [1, 1, TB] lane-dense scores
):
    f32 = jnp.float32
    L, TB, H = qwe_ref.shape

    def leaky(x):                              # nn.LeakyReLU default slope 0.01
        return jnp.maximum(x, 0.01 * x)

    def norm2_pair(a, b):
        # F.normalize(cat([a, b], -1), dim=-1) without materializing the concat
        ss = (jnp.sum(a * a, axis=-1, keepdims=True)
              + jnp.sum(b * b, axis=-1, keepdims=True))
        inv = lax.rsqrt(jnp.maximum(ss, 1e-24))   # == 1 / max(||x||, 1e-12)
        return a * inv, b * inv

    def linear_pair(a, b, wa_ref, wb_ref, bias_ref):
        # cat([a, b], -1) @ W + bias  with W pre-split into top/bottom halves
        return (jnp.dot(a, wa_ref[...], preferred_element_type=f32)
                + jnp.dot(b, wb_ref[...], preferred_element_type=f32)
                + bias_ref[...])

    # --- query embedding: single-layer tanh RNN (batch_first), h0 = 0,
    #     last timestep hidden state.  Input projection hoisted to ONE matmul.
    x2 = qwe_ref[...].reshape(L * TB, H)                       # [L*TB, H]
    xp = (jnp.dot(x2, w_ih_ref[...], preferred_element_type=f32)
          + b_rnn_ref[...])                                    # [L*TB, H]
    w_hh = w_hh_ref[...]
    h = jnp.zeros((TB, H), f32)
    for t in range(L):                                         # L static (query_max_length)
        h = jnp.tanh(xp[t * TB:(t + 1) * TB, :]
                     + jnp.dot(h, w_hh, preferred_element_type=f32))
    qw_embs = h                                                # [TB, H]

    # --- u_latent / i_latent: Aggregation(Linear + LeakyReLU) on normalized cat
    u_a, u_b = norm2_pair(u_ps_ref[...], u_kg_ref[...])
    u_latent = leaky(linear_pair(u_a, u_b, gu_wa_ref, gu_wb_ref, gu_b_ref))
    i_a, i_b = norm2_pair(i_ps_ref[...], i_kg_ref[...])
    i_latent = leaky(linear_pair(i_a, i_b, gi_wa_ref, gi_wb_ref, gi_b_ref))

    # --- two-layer MLP (Linear -> LeakyReLU -> Linear) on normalized cat ------
    def mlp2(a, b, w1a, w1b, b1, w2, b2):
        a_n, b_n = norm2_pair(a, b)
        h1 = leaky(linear_pair(a_n, b_n, w1a, w1b, b1))
        return jnp.dot(h1, w2[...], preferred_element_type=f32) + b2[...]

    uq_latent = mlp2(u_latent, qw_embs,
                     uq_w1a_ref, uq_w1b_ref, uq_b1_ref, uq_w2_ref, uq_b2_ref)
    ui_latent = mlp2(u_latent, i_latent,
                     ui_w1a_ref, ui_w1b_ref, ui_b1_ref, ui_w2_ref, ui_b2_ref)

    # --- final prediction MLP; emit the score row lane-dense ------------------
    p_a, p_b = norm2_pair(uq_latent, ui_latent)
    h1 = leaky(linear_pair(p_a, p_b, pr_w1a_ref, pr_w1b_ref, pr_b1_ref))
    # (1, H) x (TB, H)^T -> (1, TB)   (== (h1 @ w2).T, stored lane-dense)
    scores_row = lax.dot_general(
        pr_w2t_ref[...], h1,
        dimension_numbers=(((1,), (1,)), ((), ())),
        preferred_element_type=f32) + pr_b2_ref[...]
    out_ref[...] = scores_row.reshape(1, 1, TB)


# ----------------------------------------------------------------------------
# Wrapper: gathers (glue), weight pre-split, batch tiling, pallas_call
# ----------------------------------------------------------------------------
def _round_up(x, m):
    return ((x + m - 1) // m) * m


def graphsrrl_forward(params, uids, queries, items, *, max_tile_b=128):
    H = params["rnn_w_ih"].shape[0]

    # embedding-table gathers are glue, done in plain JAX
    u_ps = params["user_ps"][uids]                  # [B, H]
    u_kg = params["user_kg"][uids]                  # [B, H] (detached in torch)
    i_ps = params["item_ps"][items]                 # [B, H]
    i_kg = params["item_kg"][items]                 # [B, H]
    qwords = params["query_words_idx"][queries]     # [B, L]
    # transpose the small index matrix BEFORE the gather -> time-leading layout
    qwe_lbh = params["word_emb"][qwords.T]          # [L, B, H]

    L, B, _ = qwe_lbh.shape
    TB = min(max_tile_b, _round_up(B, 8))           # batch tile, multiple of 8
    B_pad = _round_up(B, TB)
    pad = B_pad - B

    if pad:
        qwe_lbh = jnp.pad(qwe_lbh, ((0, 0), (0, pad), (0, 0)))
        u_ps, u_kg, i_ps, i_kg = (
            jnp.pad(x, ((0, pad), (0, 0))) for x in (u_ps, u_kg, i_ps, i_kg))

    num_tiles = pl.cdiv(B_pad, TB)

    # fuse RNN biases; pre-split all concat-input weights; pre-transpose pred w2
    b_rnn = params["rnn_b_ih"] + params["rnn_b_hh"]

    def split(w):                                   # [2H, out] -> ([H,out], [H,out])
        return w[:H, :], w[H:, :]

    gu_wa, gu_wb = split(params["gu_w"])
    gi_wa, gi_wb = split(params["gi_w"])
    uq_w1a, uq_w1b = split(params["uq_w1"])
    ui_w1a, ui_w1b = split(params["ui_w1"])
    pr_w1a, pr_w1b = split(params["pr_w1"])
    pr_w2t = params["pr_w2"].T                      # [1, H]
    pr_b2 = params["pr_b2"]                         # [1, 1]

    operands = (
        qwe_lbh, u_ps, u_kg, i_ps, i_kg,
        params["rnn_w_ih"], params["rnn_w_hh"], b_rnn,
        gu_wa, gu_wb, params["gu_b"],
        gi_wa, gi_wb, params["gi_b"],
        uq_w1a, uq_w1b, params["uq_b1"], params["uq_w2"], params["uq_b2"],
        ui_w1a, ui_w1b, params["ui_b1"], params["ui_w2"], params["ui_b2"],
        pr_w1a, pr_w1b, params["pr_b1"], pr_w2t, pr_b2,
    )

    def w_spec(x):                                  # weights/biases: resident, full block
        return pl.BlockSpec(x.shape, lambda i, _r=x.ndim: (0,) * _r)

    qwe_spec = pl.BlockSpec((L, TB, H), lambda i: (0, i, 0))
    row_spec = pl.BlockSpec((TB, H), lambda i: (i, 0))

    in_specs = [qwe_spec, row_spec, row_spec, row_spec, row_spec]
    in_specs += [w_spec(x) for x in operands[5:]]

    out = pl.pallas_call(
        _graphsrrl_kernel,
        out_shape=jax.ShapeDtypeStruct((num_tiles, 1, TB), jnp.float32),
        grid=(num_tiles,),
        in_specs=in_specs,
        out_specs=pl.BlockSpec((1, 1, TB), lambda i: (i, 0, 0)),
        compiler_params=pltpu.CompilerParams(
            dimension_semantics=("parallel",),
            vmem_limit_bytes=32 * 1024 * 1024),
    )(*operands)

    return out.reshape(-1)[:B]                      # squeeze(-1), drop batch pad


# ----------------------------------------------------------------------------
# Pure-JAX reference (same math) for a correctness check
# ----------------------------------------------------------------------------
def _ref_forward(params, uids, queries, items):
    def leaky(x):
        return jnp.where(x > 0, x, 0.01 * x)

    def l2n(x):
        n = jnp.sqrt(jnp.sum(x * x, -1, keepdims=True))
        return x / jnp.maximum(n, 1e-12)

    u_ps = params["user_ps"][uids]
    u_kg = params["user_kg"][uids]
    i_ps = params["item_ps"][items]
    i_kg = params["item_kg"][items]
    qwe = params["word_emb"][params["query_words_idx"][queries]]   # [B, L, H]

    h = jnp.zeros((uids.shape[0], params["rnn_w_ih"].shape[1]), jnp.float32)
    for t in range(qwe.shape[1]):
        h = jnp.tanh(qwe[:, t, :] @ params["rnn_w_ih"] + params["rnn_b_ih"]
                     + h @ params["rnn_w_hh"] + params["rnn_b_hh"])
    qw_embs = h

    u_latent = leaky(l2n(jnp.concatenate([u_ps, u_kg], -1)) @ params["gu_w"] + params["gu_b"])
    i_latent = leaky(l2n(jnp.concatenate([i_ps, i_kg], -1)) @ params["gi_w"] + params["gi_b"])

    def mlp2(x, w1, b1, w2, b2):
        return leaky(x @ w1 + b1) @ w2 + b2

    uq = mlp2(l2n(jnp.concatenate([u_latent, qw_embs], -1)),
              params["uq_w1"], params["uq_b1"], params["uq_w2"], params["uq_b2"])
    ui = mlp2(l2n(jnp.concatenate([u_latent, i_latent], -1)),
              params["ui_w1"], params["ui_b1"], params["ui_w2"], params["ui_b2"])
    sc = mlp2(l2n(jnp.concatenate([uq, ui], -1)),
              params["pr_w1"], params["pr_b1"], params["pr_w2"], params["pr_b2"])
    return sc[:, 0]


# ----------------------------------------------------------------------------
# Deterministic parameter construction
# ----------------------------------------------------------------------------
def _xavier(key, shape):
    fan_in, fan_out = shape[0], shape[1]
    bound = float(np.sqrt(6.0 / (fan_in + fan_out)))
    return jax.random.uniform(key, shape, jnp.float32, -bound, bound)


def _row_normalize(x):
    n = jnp.sqrt(jnp.sum(x * x, -1, keepdims=True))
    return x / jnp.maximum(n, 1e-12)


def _linear(key, in_dim, out_dim):
    kw, kb = jax.random.split(key)
    bound = float(1.0 / np.sqrt(in_dim))
    w = jax.random.uniform(kw, (in_dim, out_dim), jnp.float32, -bound, bound)
    b = jax.random.uniform(kb, (1, out_dim), jnp.float32, -bound, bound)
    return w, b


def make_params(key, nuser, nitem, nquery, vocab_size, query_max_length, hidden_dim):
    keys = jax.random.split(key, 20)
    H = hidden_dim
    p = {}
    p["word_emb"] = _row_normalize(_xavier(keys[0], (vocab_size + 1, H)))
    p["user_ps"] = _row_normalize(_xavier(keys[1], (nuser, H)))
    p["item_ps"] = _row_normalize(_xavier(keys[2], (nitem, H)))
    p["user_kg"] = _row_normalize(_xavier(keys[3], (nuser, H)))
    p["item_kg"] = _row_normalize(_xavier(keys[4], (nitem, H)))
    p["query_words_idx"] = jax.random.randint(
        keys[5], (nquery, query_max_length), 0, vocab_size + 1, jnp.int32)

    # RNN (tanh, 1 layer, batch_first) -- stored pre-transposed: x @ W
    bound = float(1.0 / np.sqrt(H))
    k6a, k6b, k6c, k6d = jax.random.split(keys[6], 4)
    p["rnn_w_ih"] = jax.random.uniform(k6a, (H, H), jnp.float32, -bound, bound)
    p["rnn_w_hh"] = jax.random.uniform(k6b, (H, H), jnp.float32, -bound, bound)
    p["rnn_b_ih"] = jax.random.uniform(k6c, (1, H), jnp.float32, -bound, bound)
    p["rnn_b_hh"] = jax.random.uniform(k6d, (1, H), jnp.float32, -bound, bound)

    p["gu_w"], p["gu_b"] = _linear(keys[7], 2 * H, H)
    p["gi_w"], p["gi_b"] = _linear(keys[8], 2 * H, H)
    p["uq_w1"], p["uq_b1"] = _linear(keys[9], 2 * H, H)     # (2H)//2 = H
    p["uq_w2"], p["uq_b2"] = _linear(keys[10], H, H)
    p["ui_w1"], p["ui_b1"] = _linear(keys[11], 2 * H, H)
    p["ui_w2"], p["ui_b2"] = _linear(keys[12], H, H)
    p["pr_w1"], p["pr_b1"] = _linear(keys[13], 2 * H, H)
    p["pr_w2"], p["pr_b2"] = _linear(keys[14], H, 1)
    return p


if __name__ == "__main__":
    # small, forward-consistent shapes
    B, H = 8, 32
    nuser, nitem, nquery = 10, 12, 6
    vocab_size, query_max_length = 20, 8

    key = jax.random.PRNGKey(0)
    kp, ku, kq, ki = jax.random.split(key, 4)
    params = make_params(kp, nuser, nitem, nquery, vocab_size, query_max_length, H)

    uids = jax.random.randint(ku, (B,), 0, nuser, jnp.int32)
    queries = jax.random.randint(kq, (B,), 0, nquery, jnp.int32)
    items = jax.random.randint(ki, (B,), 0, nitem, jnp.int32)

    fwd = jax.jit(functools.partial(graphsrrl_forward, params))
    scores = jax.block_until_ready(fwd(uids, queries, items))

    ref = jax.block_until_ready(_ref_forward(params, uids, queries, items))
    np.testing.assert_allclose(np.asarray(scores), np.asarray(ref),
                               rtol=1e-3, atol=1e-3)
    assert scores.shape == (B,)
    print("KERNEL_OK")
</pallas_src>

<mosaic_0001>
module attributes {stable_mosaic.version = 11 : i64} {
  func.func @_graphsrrl_kernel(%arg0: i32, %arg1: memref<8x8x32xf32, #tpu.memory_space<vmem>>, %arg2: memref<8x32xf32, #tpu.memory_space<vmem>>, %arg3: memref<8x32xf32, #tpu.memory_space<vmem>>, %arg4: memref<8x32xf32, #tpu.memory_space<vmem>>, %arg5: memref<8x32xf32, #tpu.memory_space<vmem>>, %arg6: memref<32x32xf32, #tpu.memory_space<vmem>>, %arg7: memref<32x32xf32, #tpu.memory_space<vmem>>, %arg8: memref<1x32xf32, #tpu.memory_space<vmem>>, %arg9: memref<32x32xf32, #tpu.memory_space<vmem>>, %arg10: memref<32x32xf32, #tpu.memory_space<vmem>>, %arg11: memref<1x32xf32, #tpu.memory_space<vmem>>, %arg12: memref<32x32xf32, #tpu.memory_space<vmem>>, %arg13: memref<32x32xf32, #tpu.memory_space<vmem>>, %arg14: memref<1x32xf32, #tpu.memory_space<vmem>>, %arg15: memref<32x32xf32, #tpu.memory_space<vmem>>, %arg16: memref<32x32xf32, #tpu.memory_space<vmem>>, %arg17: memref<1x32xf32, #tpu.memory_space<vmem>>, %arg18: memref<32x32xf32, #tpu.memory_space<vmem>>, %arg19: memref<1x32xf32, #tpu.memory_space<vmem>>, %arg20: memref<32x32xf32, #tpu.memory_space<vmem>>, %arg21: memref<32x32xf32, #tpu.memory_space<vmem>>, %arg22: memref<1x32xf32, #tpu.memory_space<vmem>>, %arg23: memref<32x32xf32, #tpu.memory_space<vmem>>, %arg24: memref<1x32xf32, #tpu.memory_space<vmem>>, %arg25: memref<32x32xf32, #tpu.memory_space<vmem>>, %arg26: memref<32x32xf32, #tpu.memory_space<vmem>>, %arg27: memref<1x32xf32, #tpu.memory_space<vmem>>, %arg28: memref<1x32xf32, #tpu.memory_space<vmem>>, %arg29: memref<1x1xf32, #tpu.memory_space<vmem>>, %arg30: memref<1x1x8xf32, #tpu.memory_space<vmem>>) attributes {dimension_semantics = [#tpu.dimension_semantics<parallel>], iteration_bounds = array<i64: 1>, scalar_prefetch = 0 : i64, scratch_operands = 0 : i64, tpu.core_type = #tpu.core_type<tc>, window_params = [{transform_indices = @transform_0, window_bounds = array<i64: 8, 8, 32>}, {transform_indices = @transform_1, window_bounds = array<i64: 8, 32>}, {transform_indices = @transform_2, window_bounds = array<i64: 8, 32>}, {transform_indices = @transform_3, window_bounds = array<i64: 8, 32>}, {transform_indices = @transform_4, window_bounds = array<i64: 8, 32>}, {pipeline_mode = #tpu.pipeline_mode<synchronous>, transform_indices = @transform_5, window_bounds = array<i64: 32, 32>}, {pipeline_mode = #tpu.pipeline_mode<synchronous>, transform_indices = @transform_6, window_bounds = array<i64: 32, 32>}, {pipeline_mode = #tpu.pipeline_mode<synchronous>, transform_indices = @transform_7, window_bounds = array<i64: 1, 32>}, {pipeline_mode = #tpu.pipeline_mode<synchronous>, transform_indices = @transform_8, window_bounds = array<i64: 32, 32>}, {pipeline_mode = #tpu.pipeline_mode<synchronous>, transform_indices = @transform_9, window_bounds = array<i64: 32, 32>}, {pipeline_mode = #tpu.pipeline_mode<synchronous>, transform_indices = @transform_10, window_bounds = array<i64: 1, 32>}, {pipeline_mode = #tpu.pipeline_mode<synchronous>, transform_indices = @transform_11, window_bounds = array<i64: 32, 32>}, {pipeline_mode = #tpu.pipeline_mode<synchronous>, transform_indices = @transform_12, window_bounds = array<i64: 32, 32>}, {pipeline_mode = #tpu.pipeline_mode<synchronous>, transform_indices = @transform_13, window_bounds = array<i64: 1, 32>}, {pipeline_mode = #tpu.pipeline_mode<synchronous>, transform_indices = @transform_14, window_bounds = array<i64: 32, 32>}, {pipeline_mode = #tpu.pipeline_mode<synchronous>, transform_indices = @transform_15, window_bounds = array<i64: 32, 32>}, {pipeline_mode = #tpu.pipeline_mode<synchronous>, transform_indices = @transform_16, window_bounds = array<i64: 1, 32>}, {pipeline_mode = #tpu.pipeline_mode<synchronous>, transform_indices = @transform_17, window_bounds = array<i64: 32, 32>}, {pipeline_mode = #tpu.pipeline_mode<synchronous>, transform_indices = @transform_18, window_bounds = array<i64: 1, 32>}, {pipeline_mode = #tpu.pipeline_mode<synchronous>, transform_indices = @transform_19, window_bounds = array<i64: 32, 32>}, {pipeline_mode = #tpu.pipeline_mode<synchronous>, transform_indices = @transform_20, window_bounds = array<i64: 32, 32>}, {pipeline_mode = #tpu.pipeline_mode<synchronous>, transform_indices = @transform_21, window_bounds = array<i64: 1, 32>}, {pipeline_mode = #tpu.pipeline_mode<synchronous>, transform_indices = @transform_22, window_bounds = array<i64: 32, 32>}, {pipeline_mode = #tpu.pipeline_mode<synchronous>, transform_indices = @transform_23, window_bounds = array<i64: 1, 32>}, {pipeline_mode = #tpu.pipeline_mode<synchronous>, transform_indices = @transform_24, window_bounds = array<i64: 32, 32>}, {pipeline_mode = #tpu.pipeline_mode<synchronous>, transform_indices = @transform_25, window_bounds = array<i64: 32, 32>}, {pipeline_mode = #tpu.pipeline_mode<synchronous>, transform_indices = @transform_26, window_bounds = array<i64: 1, 32>}, {pipeline_mode = #tpu.pipeline_mode<synchronous>, transform_indices = @transform_27, window_bounds = array<i64: 1, 32>}, {pipeline_mode = #tpu.pipeline_mode<synchronous>, transform_indices = @transform_28, window_bounds = array<i64: 1, 1>}, {transform_indices = @transform_29, window_bounds = array<i64: 1, 1, 8>}]} {
    %c0 = arith.constant 0 : index
    %c0_0 = arith.constant 0 : index
    %c0_1 = arith.constant 0 : index
    %0 = vector.load %arg1[%c0, %c0_0, %c0_1] : memref<8x8x32xf32, #tpu.memory_space<vmem>>, vector<8x8x32xf32>
    %1 = vector.shape_cast %0 : vector<8x8x32xf32> to vector<64x32xf32>
    %c0_2 = arith.constant 0 : index
    %c0_3 = arith.constant 0 : index
    %2 = vector.load %arg6[%c0_2, %c0_3] : memref<32x32xf32, #tpu.memory_space<vmem>>, vector<32x32xf32>
    %cst = arith.constant dense<0.000000e+00> : vector<64x32xf32>
    %3 = tpu.matmul %1, %2, %cst {dimension_numbers = #tpu.dot_dimension_numbers<[1], [0], [0], [1], [0, 0, 1, 1], [], []>} : vector<64x32xf32>, vector<32x32xf32>, vector<64x32xf32> -> vector<64x32xf32>
    %c0_4 = arith.constant 0 : index
    %c0_5 = arith.constant 0 : index
    %4 = vector.load %arg8[%c0_4, %c0_5] : memref<1x32xf32, #tpu.memory_space<vmem>>, vector<1x32xf32>
    %5 = vector.broadcast %4 : vector<1x32xf32> to vector<64x32xf32>
    %6 = arith.addf %3, %5 : vector<64x32xf32>
    %c0_6 = arith.constant 0 : index
    %c0_7 = arith.constant 0 : index
    %7 = vector.load %arg7[%c0_6, %c0_7] : memref<32x32xf32, #tpu.memory_space<vmem>>, vector<32x32xf32>
    %cst_8 = arith.constant 0.000000e+00 : f32
    %8 = vector.broadcast %cst_8 : f32 to vector<8x32xf32>
    %9 = vector.extract_strided_slice %6 {offsets = [0, 0], sizes = [8, 32], strides = [1, 1]} : vector<64x32xf32> to vector<8x32xf32>
    %cst_9 = arith.constant dense<0.000000e+00> : vector<8x32xf32>
    %10 = tpu.matmul %8, %7, %cst_9 {dimension_numbers = #tpu.dot_dimension_numbers<[1], [0], [0], [1], [0, 0, 1, 1], [], []>} : vector<8x32xf32>, vector<32x32xf32>, vector<8x32xf32> -> vector<8x32xf32>
    %11 = arith.addf %9, %10 : vector<8x32xf32>
    %12 = math.tanh %11 : vector<8x32xf32>
    %13 = vector.extract_strided_slice %6 {offsets = [8, 0], sizes = [8, 32], strides = [1, 1]} : vector<64x32xf32> to vector<8x32xf32>
    %cst_10 = arith.constant dense<0.000000e+00> : vector<8x32xf32>
    %14 = tpu.matmul %12, %7, %cst_10 {dimension_numbers = #tpu.dot_dimension_numbers<[1], [0], [0], [1], [0, 0, 1, 1], [], []>} : vector<8x32xf32>, vector<32x32xf32>, vector<8x32xf32> -> vector<8x32xf32>
    %15 = arith.addf %13, %14 : vector<8x32xf32>
    %16 = math.tanh %15 : vector<8x32xf32>
    %17 = vector.extract_strided_slice %6 {offsets = [16, 0], sizes = [8, 32], strides = [1, 1]} : vector<64x32xf32> to vector<8x32xf32>
    %cst_11 = arith.constant dense<0.000000e+00> : vector<8x32xf32>
    %18 = tpu.matmul %16, %7, %cst_11 {dimension_numbers = #tpu.dot_dimension_numbers<[1], [0], [0], [1], [0, 0, 1, 1], [], []>} : vector<8x32xf32>, vector<32x32xf32>, vector<8x32xf32> -> vector<8x32xf32>
    %19 = arith.addf %17, %18 : vector<8x32xf32>
    %20 = math.tanh %19 : vector<8x32xf32>
    %21 = vector.extract_strided_slice %6 {offsets = [24, 0], sizes = [8, 32], strides = [1, 1]} : vector<64x32xf32> to vector<8x32xf32>
    %cst_12 = arith.constant dense<0.000000e+00> : vector<8x32xf32>
    %22 = tpu.matmul %20, %7, %cst_12 {dimension_numbers = #tpu.dot_dimension_numbers<[1], [0], [0], [1], [0, 0, 1, 1], [], []>} : vector<8x32xf32>, vector<32x32xf32>, vector<8x32xf32> -> vector<8x32xf32>
    %23 = arith.addf %21, %22 : vector<8x32xf32>
    %24 = math.tanh %23 : vector<8x32xf32>
    %25 = vector.extract_strided_slice %6 {offsets = [32, 0], sizes = [8, 32], strides = [1, 1]} : vector<64x32xf32> to vector<8x32xf32>
    %cst_13 = arith.constant dense<0.000000e+00> : vector<8x32xf32>
    %26 = tpu.matmul %24, %7, %cst_13 {dimension_numbers = #tpu.dot_dimension_numbers<[1], [0], [0], [1], [0, 0, 1, 1], [], []>} : vector<8x32xf32>, vector<32x32xf32>, vector<8x32xf32> -> vector<8x32xf32>
    %27 = arith.addf %25, %26 : vector<8x32xf32>
    %28 = math.tanh %27 : vector<8x32xf32>
    %29 = vector.extract_strided_slice %6 {offsets = [40, 0], sizes = [8, 32], strides = [1, 1]} : vector<64x32xf32> to vector<8x32xf32>
    %cst_14 = arith.constant dense<0.000000e+00> : vector<8x32xf32>
    %30 = tpu.matmul %28, %7, %cst_14 {dimension_numbers = #tpu.dot_dimension_numbers<[1], [0], [0], [1], [0, 0, 1, 1], [], []>} : vector<8x32xf32>, vector<32x32xf32>, vector<8x32xf32> -> vector<8x32xf32>
    %31 = arith.addf %29, %30 : vector<8x32xf32>
    %32 = math.tanh %31 : vector<8x32xf32>
    %33 = vector.extract_strided_slice %6 {offsets = [48, 0], sizes = [8, 32], strides = [1, 1]} : vector<64x32xf32> to vector<8x32xf32>
    %cst_15 = arith.constant dense<0.000000e+00> : vector<8x32xf32>
    %34 = tpu.matmul %32, %7, %cst_15 {dimension_numbers = #tpu.dot_dimension_numbers<[1], [0], [0], [1], [0, 0, 1, 1], [], []>} : vector<8x32xf32>, vector<32x32xf32>, vector<8x32xf32> -> vector<8x32xf32>
    %35 = arith.addf %33, %34 : vector<8x32xf32>
    %36 = math.tanh %35 : vector<8x32xf32>
    %37 = vector.extract_strided_slice %6 {offsets = [56, 0], sizes = [8, 32], strides = [1, 1]} : vector<64x32xf32> to vector<8x32xf32>
    %cst_16 = arith.constant dense<0.000000e+00> : vector<8x32xf32>
    %38 = tpu.matmul %36, %7, %cst_16 {dimension_numbers = #tpu.dot_dimension_numbers<[1], [0], [0], [1], [0, 0, 1, 1], [], []>} : vector<8x32xf32>, vector<32x32xf32>, vector<8x32xf32> -> vector<8x32xf32>
    %39 = arith.addf %37, %38 : vector<8x32xf32>
    %40 = math.tanh %39 : vector<8x32xf32>
    %c0_17 = arith.constant 0 : index
    %c0_18 = arith.constant 0 : index
    %41 = vector.load %arg2[%c0_17, %c0_18] : memref<8x32xf32, #tpu.memory_space<vmem>>, vector<8x32xf32>
    %c0_19 = arith.constant 0 : index
    %c0_20 = arith.constant 0 : index
    %42 = vector.load %arg3[%c0_19, %c0_20] : memref<8x32xf32, #tpu.memory_space<vmem>>, vector<8x32xf32>
    %43 = arith.mulf %41, %41 : vector<8x32xf32>
    %cst_21 = arith.constant dense<0.000000e+00> : vector<8xf32>
    %44 = vector.multi_reduction <add>, %43, %cst_21 [1] : vector<8x32xf32> to vector<8xf32>
    %45 = vector.shape_cast %44 : vector<8xf32> to vector<8x1xf32>
    %46 = arith.mulf %42, %42 : vector<8x32xf32>
    %cst_22 = arith.constant dense<0.000000e+00> : vector<8xf32>
    %47 = vector.multi_reduction <add>, %46, %cst_22 [1] : vector<8x32xf32> to vector<8xf32>
    %48 = vector.shape_cast %47 : vector<8xf32> to vector<8x1xf32>
    %49 = arith.addf %45, %48 : vector<8x1xf32>
    %cst_23 = arith.constant 1.000000e-24 : f32
    %50 = vector.broadcast %cst_23 : f32 to vector<8x1xf32>
    %51 = arith.maximumf %49, %50 : vector<8x1xf32>
    %52 = math.rsqrt %51 : vector<8x1xf32>
    %53 = vector.broadcast %52 : vector<8x1xf32> to vector<8x32xf32>
    %54 = arith.mulf %41, %53 : vector<8x32xf32>
    %55 = vector.broadcast %52 : vector<8x1xf32> to vector<8x32xf32>
    %56 = arith.mulf %42, %55 : vector<8x32xf32>
    %c0_24 = arith.constant 0 : index
    %c0_25 = arith.constant 0 : index
    %57 = vector.load %arg9[%c0_24, %c0_25] : memref<32x32xf32, #tpu.memory_space<vmem>>, vector<32x32xf32>
    %cst_26 = arith.constant dense<0.000000e+00> : vector<8x32xf32>
    %58 = tpu.matmul %54, %57, %cst_26 {dimension_numbers = #tpu.dot_dimension_numbers<[1], [0], [0], [1], [0, 0, 1, 1], [], []>} : vector<8x32xf32>, vector<32x32xf32>, vector<8x32xf32> -> vector<8x32xf32>
    %c0_27 = arith.constant 0 : index
    %c0_28 = arith.constant 0 : index
    %59 = vector.load %arg10[%c0_27, %c0_28] : memref<32x32xf32, #tpu.memory_space<vmem>>, vector<32x32xf32>
    %cst_29 = arith.constant dense<0.000000e+00> : vector<8x32xf32>
    %60 = tpu.matmul %56, %59, %cst_29 {dimension_numbers = #tpu.dot_dimension_numbers<[1], [0], [0], [1], [0, 0, 1, 1], [], []>} : vector<8x32xf32>, vector<32x32xf32>, vector<8x32xf32> -> vector<8x32xf32>
    %61 = arith.addf %58, %60 : vector<8x32xf32>
    %c0_30 = arith.constant 0 : index
    %c0_31 = arith.constant 0 : index
    %62 = vector.load %arg11[%c0_30, %c0_31] : memref<1x32xf32, #tpu.memory_space<vmem>>, vector<1x32xf32>
    %63 = vector.broadcast %62 : vector<1x32xf32> to vector<8x32xf32>
    %64 = arith.addf %61, %63 : vector<8x32xf32>
    %cst_32 = arith.constant 0.00999999977 : f32
    %65 = vector.broadcast %cst_32 : f32 to vector<8x32xf32>
    %66 = arith.mulf %65, %64 : vector<8x32xf32>
    %67 = arith.maximumf %64, %66 : vector<8x32xf32>
    %c0_33 = arith.constant 0 : index
    %c0_34 = arith.constant 0 : index
    %68 = vector.load %arg4[%c0_33, %c0_34] : memref<8x32xf32, #tpu.memory_space<vmem>>, vector<8x32xf32>
    %c0_35 = arith.constant 0 : index
    %c0_36 = arith.constant 0 : index
    %69 = vector.load %arg5[%c0_35, %c0_36] : memref<8x32xf32, #tpu.memory_space<vmem>>, vector<8x32xf32>
    %70 = arith.mulf %68, %68 : vector<8x32xf32>
    %cst_37 = arith.constant dense<0.000000e+00> : vector<8xf32>
    %71 = vector.multi_reduction <add>, %70, %cst_37 [1] : vector<8x32xf32> to vector<8xf32>
    %72 = vector.shape_cast %71 : vector<8xf32> to vector<8x1xf32>
    %73 = arith.mulf %69, %69 : vector<8x32xf32>
    %cst_38 = arith.constant dense<0.000000e+00> : vector<8xf32>
    %74 = vector.multi_reduction <add>, %73, %cst_38 [1] : vector<8x32xf32> to vector<8xf32>
    %75 = vector.shape_cast %74 : vector<8xf32> to vector<8x1xf32>
    %76 = arith.addf %72, %75 : vector<8x1xf32>
    %cst_39 = arith.constant 1.000000e-24 : f32
    %77 = vector.broadcast %cst_39 : f32 to vector<8x1xf32>
    %78 = arith.maximumf %76, %77 : vector<8x1xf32>
    %79 = math.rsqrt %78 : vector<8x1xf32>
    %80 = vector.broadcast %79 : vector<8x1xf32> to vector<8x32xf32>
    %81 = arith.mulf %68, %80 : vector<8x32xf32>
    %82 = vector.broadcast %79 : vector<8x1xf32> to vector<8x32xf32>
    %83 = arith.mulf %69, %82 : vector<8x32xf32>
    %c0_40 = arith.constant 0 : index
    %c0_41 = arith.constant 0 : index
    %84 = vector.load %arg12[%c0_40, %c0_41] : memref<32x32xf32, #tpu.memory_space<vmem>>, vector<32x32xf32>
    %cst_42 = arith.constant dense<0.000000e+00> : vector<8x32xf32>
    %85 = tpu.matmul %81, %84, %cst_42 {dimension_numbers = #tpu.dot_dimension_numbers<[1], [0], [0], [1], [0, 0, 1, 1], [], []>} : vector<8x32xf32>, vector<32x32xf32>, vector<8x32xf32> -> vector<8x32xf32>
    %c0_43 = arith.constant 0 : index
    %c0_44 = arith.constant 0 : index
    %86 = vector.load %arg13[%c0_43, %c0_44] : memref<32x32xf32, #tpu.memory_space<vmem>>, vector<32x32xf32>
    %cst_45 = arith.constant dense<0.000000e+00> : vector<8x32xf32>
    %87 = tpu.matmul %83, %86, %cst_45 {dimension_numbers = #tpu.dot_dimension_numbers<[1], [0], [0], [1], [0, 0, 1, 1], [], []>} : vector<8x32xf32>, vector<32x32xf32>, vector<8x32xf32> -> vector<8x32xf32>
    %88 = arith.addf %85, %87 : vector<8x32xf32>
    %c0_46 = arith.constant 0 : index
    %c0_47 = arith.constant 0 : index
    %89 = vector.load %arg14[%c0_46, %c0_47] : memref<1x32xf32, #tpu.memory_space<vmem>>, vector<1x32xf32>
    %90 = vector.broadcast %89 : vector<1x32xf32> to vector<8x32xf32>
    %91 = arith.addf %88, %90 : vector<8x32xf32>
    %cst_48 = arith.constant 0.00999999977 : f32
    %92 = vector.broadcast %cst_48 : f32 to vector<8x32xf32>
    %93 = arith.mulf %92, %91 : vector<8x32xf32>
    %94 = arith.maximumf %91, %93 : vector<8x32xf32>
    %95 = arith.mulf %67, %67 : vector<8x32xf32>
    %cst_49 = arith.constant dense<0.000000e+00> : vector<8xf32>
    %96 = vector.multi_reduction <add>, %95, %cst_49 [1] : vector<8x32xf32> to vector<8xf32>
    %97 = vector.shape_cast %96 : vector<8xf32> to vector<8x1xf32>
    %98 = arith.mulf %40, %40 : vector<8x32xf32>
    %cst_50 = arith.constant dense<0.000000e+00> : vector<8xf32>
    %99 = vector.multi_reduction <add>, %98, %cst_50 [1] : vector<8x32xf32> to vector<8xf32>
    %100 = vector.shape_cast %99 : vector<8xf32> to vector<8x1xf32>
    %101 = arith.addf %97, %100 : vector<8x1xf32>
    %cst_51 = arith.constant 1.000000e-24 : f32
    %102 = vector.broadcast %cst_51 : f32 to vector<8x1xf32>
    %103 = arith.maximumf %101, %102 : vector<8x1xf32>
    %104 = math.rsqrt %103 : vector<8x1xf32>
    %105 = vector.broadcast %104 : vector<8x1xf32> to vector<8x32xf32>
    %106 = arith.mulf %67, %105 : vector<8x32xf32>
    %107 = vector.broadcast %104 : vector<8x1xf32> to vector<8x32xf32>
    %108 = arith.mulf %40, %107 : vector<8x32xf32>
    %c0_52 = arith.constant 0 : index
    %c0_53 = arith.constant 0 : index
    %109 = vector.load %arg15[%c0_52, %c0_53] : memref<32x32xf32, #tpu.memory_space<vmem>>, vector<32x32xf32>
    %cst_54 = arith.constant dense<0.000000e+00> : vector<8x32xf32>
    %110 = tpu.matmul %106, %109, %cst_54 {dimension_numbers = #tpu.dot_dimension_numbers<[1], [0], [0], [1], [0, 0, 1, 1], [], []>} : vector<8x32xf32>, vector<32x32xf32>, vector<8x32xf32> -> vector<8x32xf32>
    %c0_55 = arith.constant 0 : index
    %c0_56 = arith.constant 0 : index
    %111 = vector.load %arg16[%c0_55, %c0_56] : memref<32x32xf32, #tpu.memory_space<vmem>>, vector<32x32xf32>
    %cst_57 = arith.constant dense<0.000000e+00> : vector<8x32xf32>
    %112 = tpu.matmul %108, %111, %cst_57 {dimension_numbers = #tpu.dot_dimension_numbers<[1], [0], [0], [1], [0, 0, 1, 1], [], []>} : vector<8x32xf32>, vector<32x32xf32>, vector<8x32xf32> -> vector<8x32xf32>
    %113 = arith.addf %110, %112 : vector<8x32xf32>
    %c0_58 = arith.constant 0 : index
    %c0_59 = arith.constant 0 : index
    %114 = vector.load %arg17[%c0_58, %c0_59] : memref<1x32xf32, #tpu.memory_space<vmem>>, vector<1x32xf32>
    %115 = vector.broadcast %114 : vector<1x32xf32> to vector<8x32xf32>
    %116 = arith.addf %113, %115 : vector<8x32xf32>
    %cst_60 = arith.constant 0.00999999977 : f32
    %117 = vector.broadcast %cst_60 : f32 to vector<8x32xf32>
    %118 = arith.mulf %117, %116 : vector<8x32xf32>
    %119 = arith.maximumf %116, %118 : vector<8x32xf32>
    %c0_61 = arith.constant 0 : index
    %c0_62 = arith.constant 0 : index
    %120 = vector.load %arg18[%c0_61, %c0_62] : memref<32x32xf32, #tpu.memory_space<vmem>>, vector<32x32xf32>
    %cst_63 = arith.constant dense<0.000000e+00> : vector<8x32xf32>
    %121 = tpu.matmul %119, %120, %cst_63 {dimension_numbers = #tpu.dot_dimension_numbers<[1], [0], [0], [1], [0, 0, 1, 1], [], []>} : vector<8x32xf32>, vector<32x32xf32>, vector<8x32xf32> -> vector<8x32xf32>
    %c0_64 = arith.constant 0 : index
    %c0_65 = arith.constant 0 : index
    %122 = vector.load %arg19[%c0_64, %c0_65] : memref<1x32xf32, #tpu.memory_space<vmem>>, vector<1x32xf32>
    %123 = vector.broadcast %122 : vector<1x32xf32> to vector<8x32xf32>
    %124 = arith.addf %121, %123 : vector<8x32xf32>
    %125 = arith.mulf %67, %67 : vector<8x32xf32>
    %cst_66 = arith.constant dense<0.000000e+00> : vector<8xf32>
    %126 = vector.multi_reduction <add>, %125, %cst_66 [1] : vector<8x32xf32> to vector<8xf32>
    %127 = vector.shape_cast %126 : vector<8xf32> to vector<8x1xf32>
    %128 = arith.mulf %94, %94 : vector<8x32xf32>
    %cst_67 = arith.constant dense<0.000000e+00> : vector<8xf32>
    %129 = vector.multi_reduction <add>, %128, %cst_67 [1] : vector<8x32xf32> to vector<8xf32>
    %130 = vector.shape_cast %129 : vector<8xf32> to vector<8x1xf32>
    %131 = arith.addf %127, %130 : vector<8x1xf32>
    %cst_68 = arith.constant 1.000000e-24 : f32
    %132 = vector.broadcast %cst_68 : f32 to vector<8x1xf32>
    %133 = arith.maximumf %131, %132 : vector<8x1xf32>
    %134 = math.rsqrt %133 : vector<8x1xf32>
    %135 = vector.broadcast %134 : vector<8x1xf32> to vector<8x32xf32>
    %136 = arith.mulf %67, %135 : vector<8x32xf32>
    %137 = vector.broadcast %134 : vector<8x1xf32> to vector<8x32xf32>
    %138 = arith.mulf %94, %137 : vector<8x32xf32>
    %c0_69 = arith.constant 0 : index
    %c0_70 = arith.constant 0 : index
    %139 = vector.load %arg20[%c0_69, %c0_70] : memref<32x32xf32, #tpu.memory_space<vmem>>, vector<32x32xf32>
    %cst_71 = arith.constant dense<0.000000e+00> : vector<8x32xf32>
    %140 = tpu.matmul %136, %139, %cst_71 {dimension_numbers = #tpu.dot_dimension_numbers<[1], [0], [0], [1], [0, 0, 1, 1], [], []>} : vector<8x32xf32>, vector<32x32xf32>, vector<8x32xf32> -> vector<8x32xf32>
    %c0_72 = arith.constant 0 : index
    %c0_73 = arith.constant 0 : index
    %141 = vector.load %arg21[%c0_72, %c0_73] : memref<32x32xf32, #tpu.memory_space<vmem>>, vector<32x32xf32>
    %cst_74 = arith.constant dense<0.000000e+00> : vector<8x32xf32>
    %142 = tpu.matmul %138, %141, %cst_74 {dimension_numbers = #tpu.dot_dimension_numbers<[1], [0], [0], [1], [0, 0, 1, 1], [], []>} : vector<8x32xf32>, vector<32x32xf32>, vector<8x32xf32> -> vector<8x32xf32>
    %143 = arith.addf %140, %142 : vector<8x32xf32>
    %c0_75 = arith.constant 0 : index
    %c0_76 = arith.constant 0 : index
    %144 = vector.load %arg22[%c0_75, %c0_76] : memref<1x32xf32, #tpu.memory_space<vmem>>, vector<1x32xf32>
    %145 = vector.broadcast %144 : vector<1x32xf32> to vector<8x32xf32>
    %146 = arith.addf %143, %145 : vector<8x32xf32>
    %cst_77 = arith.constant 0.00999999977 : f32
    %147 = vector.broadcast %cst_77 : f32 to vector<8x32xf32>
    %148 = arith.mulf %147, %146 : vector<8x32xf32>
    %149 = arith.maximumf %146, %148 : vector<8x32xf32>
    %c0_78 = arith.constant 0 : index
    %c0_79 = arith.constant 0 : index
    %150 = vector.load %arg23[%c0_78, %c0_79] : memref<32x32xf32, #tpu.memory_space<vmem>>, vector<32x32xf32>
    %cst_80 = arith.constant dense<0.000000e+00> : vector<8x32xf32>
    %151 = tpu.matmul %149, %150, %cst_80 {dimension_numbers = #tpu.dot_dimension_numbers<[1], [0], [0], [1], [0, 0, 1, 1], [], []>} : vector<8x32xf32>, vector<32x32xf32>, vector<8x32xf32> -> vector<8x32xf32>
    %c0_81 = arith.constant 0 : index
    %c0_82 = arith.constant 0 : index
    %152 = vector.load %arg24[%c0_81, %c0_82] : memref<1x32xf32, #tpu.memory_space<vmem>>, vector<1x32xf32>
    %153 = vector.broadcast %152 : vector<1x32xf32> to vector<8x32xf32>
    %154 = arith.addf %151, %153 : vector<8x32xf32>
    %155 = arith.mulf %124, %124 : vector<8x32xf32>
    %cst_83 = arith.constant dense<0.000000e+00> : vector<8xf32>
    %156 = vector.multi_reduction <add>, %155, %cst_83 [1] : vector<8x32xf32> to vector<8xf32>
    %157 = vector.shape_cast %156 : vector<8xf32> to vector<8x1xf32>
    %158 = arith.mulf %154, %154 : vector<8x32xf32>
    %cst_84 = arith.constant dense<0.000000e+00> : vector<8xf32>
    %159 = vector.multi_reduction <add>, %158, %cst_84 [1] : vector<8x32xf32> to vector<8xf32>
    %160 = vector.shape_cast %159 : vector<8xf32> to vector<8x1xf32>
    %161 = arith.addf %157, %160 : vector<8x1xf32>
    %cst_85 = arith.constant 1.000000e-24 : f32
    %162 = vector.broadcast %cst_85 : f32 to vector<8x1xf32>
    %163 = arith.maximumf %161, %162 : vector<8x1xf32>
    %164 = math.rsqrt %163 : vector<8x1xf32>
    %165 = vector.broadcast %164 : vector<8x1xf32> to vector<8x32xf32>
    %166 = arith.mulf %124, %165 : vector<8x32xf32>
    %167 = vector.broadcast %164 : vector<8x1xf32> to vector<8x32xf32>
    %168 = arith.mulf %154, %167 : vector<8x32xf32>
    %c0_86 = arith.constant 0 : index
    %c0_87 = arith.constant 0 : index
    %169 = vector.load %arg25[%c0_86, %c0_87] : memref<32x32xf32, #tpu.memory_space<vmem>>, vector<32x32xf32>
    %cst_88 = arith.constant dense<0.000000e+00> : vector<8x32xf32>
    %170 = tpu.matmul %166, %169, %cst_88 {dimension_numbers = #tpu.dot_dimension_numbers<[1], [0], [0], [1], [0, 0, 1, 1], [], []>} : vector<8x32xf32>, vector<32x32xf32>, vector<8x32xf32> -> vector<8x32xf32>
    %c0_89 = arith.constant 0 : index
    %c0_90 = arith.constant 0 : index
    %171 = vector.load %arg26[%c0_89, %c0_90] : memref<32x32xf32, #tpu.memory_space<vmem>>, vector<32x32xf32>
    %cst_91 = arith.constant dense<0.000000e+00> : vector<8x32xf32>
    %172 = tpu.matmul %168, %171, %cst_91 {dimension_numbers = #tpu.dot_dimension_numbers<[1], [0], [0], [1], [0, 0, 1, 1], [], []>} : vector<8x32xf32>, vector<32x32xf32>, vector<8x32xf32> -> vector<8x32xf32>
    %173 = arith.addf %170, %172 : vector<8x32xf32>
    %c0_92 = arith.constant 0 : index
    %c0_93 = arith.constant 0 : index
    %174 = vector.load %arg27[%c0_92, %c0_93] : memref<1x32xf32, #tpu.memory_space<vmem>>, vector<1x32xf32>
    %175 = vector.broadcast %174 : vector<1x32xf32> to vector<8x32xf32>
    %176 = arith.addf %173, %175 : vector<8x32xf32>
    %cst_94 = arith.constant 0.00999999977 : f32
    %177 = vector.broadcast %cst_94 : f32 to vector<8x32xf32>
    %178 = arith.mulf %177, %176 : vector<8x32xf32>
    %179 = arith.maximumf %176, %178 : vector<8x32xf32>
    %c0_95 = arith.constant 0 : index
    %c0_96 = arith.constant 0 : index
    %180 = vector.load %arg28[%c0_95, %c0_96] : memref<1x32xf32, #tpu.memory_space<vmem>>, vector<1x32xf32>
    %cst_97 = arith.constant dense<0.000000e+00> : vector<1x8xf32>
    %181 = tpu.matmul %180, %179, %cst_97 {dimension_numbers = #tpu.dot_dimension_numbers<[1], [1], [0], [0], [0, 0, 1, 0], [], []>} : vector<1x32xf32>, vector<8x32xf32>, vector<1x8xf32> -> vector<1x8xf32>
    %c0_98 = arith.constant 0 : index
    %c0_99 = arith.constant 0 : index
    %182 = vector.load %arg29[%c0_98, %c0_99] : memref<1x1xf32, #tpu.memory_space<vmem>>, vector<1x1xf32>
    %183 = vector.broadcast %182 : vector<1x1xf32> to vector<1x8xf32>
    %184 = arith.addf %181, %183 : vector<1x8xf32>
    %185 = vector.shape_cast %184 : vector<1x8xf32> to vector<1x1x8xf32>
    %c0_100 = arith.constant 0 : index
    %c0_101 = arith.constant 0 : index
    %c0_102 = arith.constant 0 : index
    %186 = vector.load %arg30[%c0_100, %c0_101, %c0_102] : memref<1x1x8xf32, #tpu.memory_space<vmem>>, vector<1x1x8xf32>
    tpu.vector_store %arg30[%c0_100, %c0_101, %c0_102], %185 {strides = array<i32>} : memref<1x1x8xf32, #tpu.memory_space<vmem>>, vector<1x1x8xf32>,
    return
  }
  func.func @transform_0(%arg0: i32) -> (i32, i32, i32) {
    %c0_i32 = arith.constant 0 : i32
    %c0_i32_0 = arith.constant 0 : i32
    %c0_i32_1 = arith.constant 0 : i32
    return %c0_i32, %arg0, %c0_i32_0 : i32, i32, i32
  }
  func.func @transform_1(%arg0: i32) -> (i32, i32) {
    %c0_i32 = arith.constant 0 : i32
    %c0_i32_0 = arith.constant 0 : i32
    return %arg0, %c0_i32 : i32, i32
  }
  func.func @transform_2(%arg0: i32) -> (i32, i32) {
    %c0_i32 = arith.constant 0 : i32
    %c0_i32_0 = arith.constant 0 : i32
    return %arg0, %c0_i32 : i32, i32
  }
  func.func @transform_3(%arg0: i32) -> (i32, i32) {
    %c0_i32 = arith.constant 0 : i32
    %c0_i32_0 = arith.constant 0 : i32
    return %arg0, %c0_i32 : i32, i32
  }
  func.func @transform_4(%arg0: i32) -> (i32, i32) {
    %c0_i32 = arith.constant 0 : i32
    %c0_i32_0 = arith.constant 0 : i32
    return %arg0, %c0_i32 : i32, i32
  }
  func.func @transform_5(%arg0: i32) -> (i32, i32) {
    %c0_i32 = arith.constant 0 : i32
    %c0_i32_0 = arith.constant 0 : i32
    %c0_i32_1 = arith.constant 0 : i32
    return %c0_i32, %c0_i32_0 : i32, i32
  }
  func.func @transform_6(%arg0: i32) -> (i32, i32) {
    %c0_i32 = arith.constant 0 : i32
    %c0_i32_0 = arith.constant 0 : i32
    %c0_i32_1 = arith.constant 0 : i32
    return %c0_i32, %c0_i32_0 : i32, i32
  }
  func.func @transform_7(%arg0: i32) -> (i32, i32) {
    %c0_i32 = arith.constant 0 : i32
    %c0_i32_0 = arith.constant 0 : i32
    %c0_i32_1 = arith.constant 0 : i32
    return %c0_i32, %c0_i32_0 : i32, i32
  }
  func.func @transform_8(%arg0: i32) -> (i32, i32) {
    %c0_i32 = arith.constant 0 : i32
    %c0_i32_0 = arith.constant 0 : i32
    %c0_i32_1 = arith.constant 0 : i32
    return %c0_i32, %c0_i32_0 : i32, i32
  }
  func.func @transform_9(%arg0: i32) -> (i32, i32) {
    %c0_i32 = arith.constant 0 : i32
    %c0_i32_0 = arith.constant 0 : i32
    %c0_i32_1 = arith.constant 0 : i32
    return %c0_i32, %c0_i32_0 : i32, i32
  }
  func.func @transform_10(%arg0: i32) -> (i32, i32) {
    %c0_i32 = arith.constant 0 : i32
    %c0_i32_0 = arith.constant 0 : i32
    %c0_i32_1 = arith.constant 0 : i32
    return %c0_i32, %c0_i32_0 : i32, i32
  }
  func.func @transform_11(%arg0: i32) -> (i32, i32) {
    %c0_i32 = arith.constant 0 : i32
    %c0_i32_0 = arith.constant 0 : i32
    %c0_i32_1 = arith.constant 0 : i32
    return %c0_i32, %c0_i32_0 : i32, i32
  }
  func.func @transform_12(%arg0: i32) -> (i32, i32) {
    %c0_i32 = arith.constant 0 : i32
    %c0_i32_0 = arith.constant 0 : i32
    %c0_i32_1 = arith.constant 0 : i32
    return %c0_i32, %c0_i32_0 : i32, i32
  }
  func.func @transform_13(%arg0: i32) -> (i32, i32) {
    %c0_i32 = arith.constant 0 : i32
    %c0_i32_0 = arith.constant 0 : i32
    %c0_i32_1 = arith.constant 0 : i32
    return %c0_i32, %c0_i32_0 : i32, i32
  }
  func.func @transform_14(%arg0: i32) -> (i32, i32) {
    %c0_i32 = arith.constant 0 : i32
    %c0_i32_0 = arith.constant 0 : i32
    %c0_i32_1 = arith.constant 0 : i32
    return %c0_i32, %c0_i32_0 : i32, i32
  }
  func.func @transform_15(%arg0: i32) -> (i32, i32) {
    %c0_i32 = arith.constant 0 : i32
    %c0_i32_0 = arith.constant 0 : i32
    %c0_i32_1 = arith.constant 0 : i32
    return %c0_i32, %c0_i32_0 : i32, i32
  }
  func.func @transform_16(%arg0: i32) -> (i32, i32) {
    %c0_i32 = arith.constant 0 : i32
    %c0_i32_0 = arith.constant 0 : i32
    %c0_i32_1 = arith.constant 0 : i32
    return %c0_i32, %c0_i32_0 : i32, i32
  }
  func.func @transform_17(%arg0: i32) -> (i32, i32) {
    %c0_i32 = arith.constant 0 : i32
    %c0_i32_0 = arith.constant 0 : i32
    %c0_i32_1 = arith.constant 0 : i32
    return %c0_i32, %c0_i32_0 : i32, i32
  }
  func.func @transform_18(%arg0: i32) -> (i32, i32) {
    %c0_i32 = arith.constant 0 : i32
    %c0_i32_0 = arith.constant 0 : i32
    %c0_i32_1 = arith.constant 0 : i32
    return %c0_i32, %c0_i32_0 : i32, i32
  }
  func.func @transform_19(%arg0: i32) -> (i32, i32) {
    %c0_i32 = arith.constant 0 : i32
    %c0_i32_0 = arith.constant 0 : i32
    %c0_i32_1 = arith.constant 0 : i32
    return %c0_i32, %c0_i32_0 : i32, i32
  }
  func.func @transform_20(%arg0: i32) -> (i32, i32) {
    %c0_i32 = arith.constant 0 : i32
    %c0_i32_0 = arith.constant 0 : i32
    %c0_i32_1 = arith.constant 0 : i32
    return %c0_i32, %c0_i32_0 : i32, i32
  }
  func.func @transform_21(%arg0: i32) -> (i32, i32) {
    %c0_i32 = arith.constant 0 : i32
    %c0_i32_0 = arith.constant 0 : i32
    %c0_i32_1 = arith.constant 0 : i32
    return %c0_i32, %c0_i32_0 : i32, i32
  }
  func.func @transform_22(%arg0: i32) -> (i32, i32) {
    %c0_i32 = arith.constant 0 : i32
    %c0_i32_0 = arith.constant 0 : i32
    %c0_i32_1 = arith.constant 0 : i32
    return %c0_i32, %c0_i32_0 : i32, i32
  }
  func.func @transform_23(%arg0: i32) -> (i32, i32) {
    %c0_i32 = arith.constant 0 : i32
    %c0_i32_0 = arith.constant 0 : i32
    %c0_i32_1 = arith.constant 0 : i32
    return %c0_i32, %c0_i32_0 : i32, i32
  }
  func.func @transform_24(%arg0: i32) -> (i32, i32) {
    %c0_i32 = arith.constant 0 : i32
    %c0_i32_0 = arith.constant 0 : i32
    %c0_i32_1 = arith.constant 0 : i32
    return %c0_i32, %c0_i32_0 : i32, i32
  }
  func.func @transform_25(%arg0: i32) -> (i32, i32) {
    %c0_i32 = arith.constant 0 : i32
    %c0_i32_0 = arith.constant 0 : i32
    %c0_i32_1 = arith.constant 0 : i32
    return %c0_i32, %c0_i32_0 : i32, i32
  }
  func.func @transform_26(%arg0: i32) -> (i32, i32) {
    %c0_i32 = arith.constant 0 : i32
    %c0_i32_0 = arith.constant 0 : i32
    %c0_i32_1 = arith.constant 0 : i32
    return %c0_i32, %c0_i32_0 : i32, i32
  }
  func.func @transform_27(%arg0: i32) -> (i32, i32) {
    %c0_i32 = arith.constant 0 : i32
    %c0_i32_0 = arith.constant 0 : i32
    %c0_i32_1 = arith.constant 0 : i32
    return %c0_i32, %c0_i32_0 : i32, i32
  }
  func.func @transform_28(%arg0: i32) -> (i32, i32) {
    %c0_i32 = arith.constant 0 : i32
    %c0_i32_0 = arith.constant 0 : i32
    %c0_i32_1 = arith.constant 0 : i32
    return %c0_i32, %c0_i32_0 : i32, i32
  }
  func.func @transform_29(%arg0: i32) -> (i32, i32, i32) {
    %c0_i32 = arith.constant 0 : i32
    %c0_i32_0 = arith.constant 0 : i32
    %c0_i32_1 = arith.constant 0 : i32
    return %arg0, %c0_i32, %c0_i32_0 : i32, i32, i32
  }
}

</mosaic_0001>

<bundles_post_ra>
// kernel: graphsrrl_forward.1
= control target key start
LH: loop header
LB: loop body
LE: loop exit
PB: predicated region body
PF: predicated region fallthrough
CT: control target
= control target key end

     0   :  { %s2673_s6 = smov 1   ;;  %s2674_s10 = smov 2   ;;  %s3115_s0 = inlined_call_operand.smem [shape: u32[30], index: -1, kind: input, shape index: {}] }
   0x1   :  { %s2715_s5 = sld [smem:[%s3115_s0]]   ;;  %s2675_s14 = smov 3  }
   0x2   :  { %s2720_s9 = sld [smem:[%s3115_s0 + %s2673_s6]]   ;;  %s2676_s18 = smov 4  }
   0x3   :  { %s2725_s13 = sld [smem:[%s3115_s0 + %s2674_s10]]   ;;  %s2677_s22 = smov 5  }
   0x4   :  { %s2730_s17 = sld [smem:[%s3115_s0 + %s2675_s14]]   ;;  %s2678_s26 = smov 6  }
   0x5   :  { %s2735_s21 = sld [smem:[%s3115_s0 + %s2676_s18]]   ;;  %s2679_s30 = smov 7  }
   0x6   :  { %s2740_s25 = sld [smem:[%s3115_s0 + %s2677_s22]]   ;;  %s2680_s4 = smov 8  }
   0x7   :  { %s2745_s29 = sld [smem:[%s3115_s0 + %s2678_s26]]   ;;  %s2681_s10 = smov 9  }
   0x8   :  { %s2750_s3 = sld [smem:[%s3115_s0 + %s2679_s30]]   ;;  %s2682_s15 = smov 10  }
   0x9   :  { %s2755_s8 = sld [smem:[%s3115_s0 + %s2680_s4]]   ;;  %s2683_s20 = smov 11  }
   0xa   :  { %s2760_s14 = sld [smem:[%s3115_s0 + %s2681_s10]]   ;;  %s2684_s26 = smov 12  }
   0xb   :  { %s2765_s19 = sld [smem:[%s3115_s0 + %s2682_s15]]   ;;  %s2685_s1 = smov 13  }
   0xc   :  { %s2770_s24 = sld [smem:[%s3115_s0 + %s2683_s20]]   ;;  %s2686_s7 = smov 14  }
   0xd   :  { %s2775_s30 = sld [smem:[%s3115_s0 + %s2684_s26]]   ;;  %s2687_s15 = smov 15  }
   0xe   :  { %s2780_s6 = sld [smem:[%s3115_s0 + %s2685_s1]]   ;;  %s2688_s22 = smov 16  }
   0xf   :  { %s2785_s12 = sld [smem:[%s3115_s0 + %s2686_s7]]   ;;  %s2689_s28 = smov 17  }
  0x10   :  { %s2790_s20 = sld [smem:[%s3115_s0 + %s2687_s15]]   ;;  %s2690_s7 = smov 18  }
  0x11   :  { %s2795_s27 = sld [smem:[%s3115_s0 + %s2688_s22]]   ;;  %s2691_s15 = smov 19  }
  0x12   :  { %s2800_s4 = sld [smem:[%s3115_s0 + %s2689_s28]]   ;;  %s2692_s22 = smov 20  }
  0x13   :  { %s2693_s28 = smov 21   ;;  %s2701_s1 = smov 29  }
  0x15   :  { %3124 = sst [smem:[#allocation6_spill]] %s2785_s12 }
  0x16   :  { %3125 = sst [smem:[#allocation7_spill]] %s2790_s20 }
  0x17   :  { %3126 = sst [smem:[#allocation8_spill]] %s2795_s27 }
  0x18   :  { %3127 = sst [smem:[#allocation9_spill]] %s2800_s4 }
  0x19   :  { %s2805_s12 = sld [smem:[%s3115_s0 + %s2690_s7]]   ;;  %s2694_s7 = smov 22  }
  0x1a   :  { %s2810_s20 = sld [smem:[%s3115_s0 + %s2691_s15]]   ;;  %s2695_s15 = smov 23  }
  0x1b   :  { %s2815_s27 = sld [smem:[%s3115_s0 + %s2692_s22]]   ;;  %s2696_s22 = smov 24  }
  0x1c   :  { %s2820_s4 = sld [smem:[%s3115_s0 + %s2693_s28]]   ;;  %s2697_s28 = smov 25  }
  0x1f   :  { %3128 = sst [smem:[#allocation10_spill]] %s2805_s12 }
  0x20   :  { %3129 = sst [smem:[#allocation11_spill]] %s2810_s20 }
  0x21   :  { %3130 = sst [smem:[#allocation12_spill]] %s2815_s27 }
  0x22   :  { %3131 = sst [smem:[#allocation13_spill]] %s2820_s4 }
  0x23   :  { %s2825_s12 = sld [smem:[%s3115_s0 + %s2694_s7]]   ;;  %s2698_s7 = smov 26  }
  0x24   :  { %s2830_s20 = sld [smem:[%s3115_s0 + %s2695_s15]]   ;;  %s2699_s15 = smov 27  }
  0x25   :  { %s2835_s27 = sld [smem:[%s3115_s0 + %s2696_s22]]   ;;  %s2700_s22 = smov 28  }
  0x26   :  { %s2840_s4 = sld [smem:[%s3115_s0 + %s2697_s28]]  }
  0x29   :  { %3132 = sst [smem:[#allocation14_spill]] %s2825_s12 }
  0x2a   :  { %3133 = sst [smem:[#allocation15_spill]] %s2830_s20 }
  0x2b   :  { %3134 = sst [smem:[#allocation16_spill]] %s2835_s27 }
  0x2c   :  { %3135 = sst [smem:[#allocation17_spill]] %s2840_s4 }
  0x2d   :  { %s2845_s12 = sld [smem:[%s3115_s0 + %s2698_s7]]  }
  0x2e   :  { %s2850_s20 = sld [smem:[%s3115_s0 + %s2699_s15]]  }
  0x2f   :  { %s2061_s27 = sld [smem:[%s3115_s0 + %s2700_s22]]  }
  0x30   :  { %s2858_s4 = sld [smem:[%s3115_s0 + %s2701_s1]]  }
  0x35   :  { %v64_v0 = vstv %s2061_s27 }
  0x36   :  { %65 = vst [vmem:[#allocation2] sm:$0x1] %v64_v0 }
  0x37   :  { %v133_v1 = vld [vmem:[%s2740_s25] sm:$0xff]  ;;  %v134_v2 = vld [vmem:[%s2740_s25 + $0x8] sm:$0xff]  ;;  %vm144_vm0 = vcmask 261120   ;;  %v2702_v5 = vmov 0.0|0.0   ;;  %v135_v7 = vld [vmem:[%s2740_s25 + $0x10] sm:$0xff]  ;;  %vm2703_vm1 = vmmov 0  }
  0x38   :  { %v274_v3 = vld [vmem:[%s2745_s29] sm:$0xff]  ;;  %v2459_v4 = vpack.c.bf16 %v134_v2, %v133_v1  ;;  %2467 = vmatprep.subr.bf16.mxu1 %v2702_v5  ;;  %v275_v6 = vld [vmem:[%s2745_s29 + $0x8] sm:$0xff]  ;;  %v136_v8 = vld [vmem:[%s2740_s25 + $0x18] sm:$0xff]  ;;  %v2704_v14 = vmov 0.0  }
  0x39   :  { %v2867_v9 = vpack.c.bf16 %v275_v6, %v274_v3  ;;  %v2463_v10 = vpack.c.bf16 %v136_v8, %v135_v7  ;;  %v125_v11 = vld [vmem:[%s2715_s5] sm:$0xff]  ;;  %v276_v12 = vld [vmem:[%s2745_s29 + $0x10] sm:$0xff]  ;;  %v277_v13 = vld [vmem:[%s2745_s29 + $0x18] sm:$0xff]  ;;  %2242 = vmatprep.mubr.msk.f32.mxu1 %vm2703_vm1, %v2704_v14 }
  0x3a   :  { %2460 = vmatprep.subr.bf16.mxu0 %v2459_v4  ;;  %2222 = vmatprep.mubr.msk.f32.mxu0 %vm144_vm0, %v125_v11 }
  0x3b   :  { %66 = vsyncpa [#allocation4], 0  ;;  %2462 = vmatpush3.bf16.msra.mxu0 %v2459_v4  ;;  %2469 = vmatpush3.bf16.msra.mxu1 %v2867_v9  ;;  %v2876_v15 = vpack.c.bf16 %v277_v13, %v276_v12  ;;  %v126_v16 = vld [vmem:[%s2715_s5 + $0x8] sm:$0xff]  ;;  %v127_v17 = vld [vmem:[%s2715_s5 + $0x10] sm:$0xff]  ;;  %s3136_s0 = sld [smem:[#allocation7_spill]]  ;;  %s3142_s25 = sld [smem:[#allocation14_spill]] }
  0x3c   :  { %2464 = vmatprep.subr.bf16.mxu0 %v2463_v10  ;;  %2470 = vmatprep.subr.bf16.mxu1 %v2702_v5  ;;  %v2898_v18 = vld [vmem:[%s2750_s3] ss:$0 sm:$0xff]  ;;  %v128_v26 = vld [vmem:[%s2715_s5 + $0x18] sm:$0xff]  ;;  %v130_v28 = vld [vmem:[%s2715_s5 + $0x28] sm:$0xff]  ;;  %s3143_s29 = sld [smem:[#allocation10_spill]]  ;;  %s3144_s3 = sld [smem:[#allocation13_spill]] }
  0x3d   :  { %v129_v27 = vld [vmem:[%s2715_s5 + $0x20] sm:$0xff]  ;;  %v131_v29 = vld [vmem:[%s2715_s5 + $0x30] sm:$0xff]  ;;  %v132_v30 = vld [vmem:[%s2715_s5 + $0x38] sm:$0xff]  ;;  %s3137_s5 = sld [smem:[#allocation6_spill]]  ;;  %vm2018_vm2 = vcmask 57344  }
  0x3e   :  { %v2957_v57 = vld [vmem:[%s2720_s9] sm:$0xff]  ;;  %s3138_s9 = sld [smem:[#allocation12_spill]] }
  0x3f   :  { %2466 = vmatpush3.bf16.msra.mxu0 %v2463_v10  ;;  %2472 = vmatpush3.bf16.msra.mxu1 %v2876_v15  ;;  %v879_v58 = vld [vmem:[%s2725_s13] sm:$0xff]  ;;  %v880_v60 = vmul.f32 %v2957_v57, %v2957_v57  ;;  %s3139_s13 = sld [smem:[#allocation9_spill]] }
  0x40   :  { %2473 = vmatprep.subr.bf16.mxu1 %v2702_v5  ;;  %2479 = vmatprep.subr.bf16.mxu0 %v2702_v5  ;;  %v2961_v59 = vld [vmem:[%s2730_s17] sm:$0xff]  ;;  %v884_v61 = vmul.f32 %v879_v58, %v879_v58  ;;  %s3140_s17 = sld [smem:[#allocation8_spill]] }
  0x41   :  { %v1059_v62 = vmul.f32 %v2961_v59, %v2961_v59  ;;  %v1058_v63 = vld [vmem:[%s2735_s21] sm:$0xff]  ;;  %v881_v1 = vsel %vm144_vm0, %v880_v60, 0.0  ;;  %s3141_s21 = sld [smem:[#allocation11_spill]] }
  0x42   :  { %2223 = vmatmul.mubr.msk.f32.vlgmr.msra.gmra.mrb[0].mxu0 %vm144_vm0, %v126_v16  ;;  %2243 = vmatmul.mubr.f32.vlgmr.msra.gmra.mrb[0].mxu1 %v2704_v14  ;;  %v1063_v0 = vmul.f32 %v1058_v63, %v1058_v63  ;;  %v885_v3 = vsel %vm144_vm0, %v884_v61, 0.0 }
  0x43   :  { %2475 = vmatpush3.bf16.msra.mxu1 %v2867_v9  ;;  %2253 = vmatprep.mubr.msk.f32.mxu1 %vm2703_vm1, %v2704_v14  ;;  %v1060_v2 = vsel %vm144_vm0, %v1059_v62, 0.0 }
  0x44   :  { %2476 = vmatprep.subr.bf16.mxu1 %v2702_v5  ;;  %2481 = vmatpush3.bf16.msra.mxu0 %v2867_v9  ;;  %v1064_v4 = vsel %vm144_vm0, %v1063_v0, 0.0 }
  0x45   :  { %2482 = vmatprep.subr.bf16.mxu0 %v2702_v5  ;;  %2225 = vmatprep.mubr.msk.f32.mxu0 %vm144_vm0, %v127_v17  ;;  %v897_v17 = vld [vmem:[%s2760_s14] sm:$0xff] }
  0x46   :  { %2226 = vmatmul.mubr.msk.f32.gmra.mrb[2].mxu0 %vm144_vm0, %v128_v26  ;;  %882 = vadd.xlane.f32.xlu0 %v881_v1 }
  0x47   :  { %2478 = vmatpush3.bf16.msra.mxu1 %v2876_v15  ;;  %2228 = vmatprep.mubr.msk.f32.mxu0 %vm144_vm0, %v129_v27 }
  0x48   :  { %2484 = vmatpush3.bf16.msra.mxu0 %v2876_v15  ;;  %2485 = vmatprep.subr.bf16.mxu1 %v2702_v5 }
  0x49   :  { %2491 = vmatprep.subr.bf16.mxu0 %v2702_v5  ;;  %1061 = vadd.xlane.f32.xlu1 %v1060_v2  ;;  %v2081_v2 = vld [vmem:[%s2765_s19] ss:$0 sm:$0xff]  ;;  %s3147_s19 = sld [smem:[#allocation16_spill]] }
  0x4a   :  { %2229 = vmatmul.mubr.msk.f32.gmra.mrb[4].mxu0 %vm144_vm0, %v130_v28  ;;  %886 = vadd.xlane.f32.xlu0 %v885_v3 }
  0x4b   :  { %2231 = vmatprep.mubr.msk.f32.mxu0 %vm144_vm0, %v131_v29  ;;  %v1076_v29 = vld [vmem:[%s2775_s30] sm:$0xff] }
  0x4d   :  { %1065 = vadd.xlane.f32.xlu1 %v1064_v4 }
  0x4e   :  { %2232 = vmatmul.mubr.msk.f32.gmra.mrb[6].mxu0 %vm144_vm0, %v132_v30  ;;  %v1077_v30 = vld [vmem:[%s2775_s30 + $0x8] sm:$0xff] }
  0x4f   :  { %2264 = vmatprep.mubr.msk.f32.mxu0 %vm2703_vm1, %v2704_v14 }
  0xd3   :  { %v883_v11 = vpop.xlane.xlu0 %882 }
  0xd6   :  { %v1062_v16 = vpop.xlane.xlu1 %1061 }
  0xd7   :  { %v887_v12 = vpop.xlane.xlu0 %886 }
  0xd8   :  { %v888_v13 = vadd.f32 %v887_v12, %v883_v11  ;;  %v2084_v12 = vld [vmem:[%s2780_s6] ss:$0 sm:$0xff] }
 0x115   :  { %v2224_v19 = vpop.f32.mrb[0].mxu0  ;;  %v347_v20 = vpop.f32.mrb[0].mxu1 }
 0x116   :  { %v235_v21 = vpop.f32.mrb[1].mxu0  ;;  %v2244_v22 = vpop.f32.mrb[1].mxu1  ;;  %v241_v31 = vadd.f32 %v2224_v19, %v2898_v18  ;;  %v898_v19 = vld [vmem:[%s2760_s14 + $0x8] sm:$0xff] }
 0x117   :  { %v236_v23 = vadd.f32 %v2898_v18, %v235_v21  ;;  %v2516_v21 = vpack.c.bf16 %v898_v19, %v897_v17  ;;  %v900_v22 = vld [vmem:[%s2760_s14 + $0x18] sm:$0xff] }
 0x119   :  { %v351_v24 = vadd.f32 %v347_v20, %v236_v23  ;;  %v2227_v36 = vpop.f32.mrb[2].mxu0  ;;  %v899_v20 = vld [vmem:[%s2760_s14 + $0x10] sm:$0xff]  ;;  %s3146_s14 = sld [smem:[#allocation17_spill]] }
 0x11a   :  { %v245_v37 = vpop.f32.mrb[3].mxu0  ;;  %v251_v47 = vadd.f32 %v2227_v36, %v2898_v18  ;;  %v2519_v23 = vpack.c.bf16 %v900_v22, %v899_v20 }
 0x11b   :  { %2623 = vtanh.f32 %v351_v24  ;;  %v246_v42 = vadd.f32 %v2898_v18, %v245_v37  ;;  %v1066_v24 = vpop.xlane.xlu1 %1065 }
 0x11d   :  { %v2230_v38 = vpop.f32.mrb[4].mxu0 }
 0x11e   :  { %v255_v39 = vpop.f32.mrb[5].mxu0  ;;  %v261_v6 = vadd.f32 %v2230_v38, %v2898_v18 }
 0x11f   :  { %v256_v52 = vadd.f32 %v2898_v18, %v255_v39 }
 0x121   :  { %v2928_v40 = vpop.f32.mrb[6].mxu0 }
 0x122   :  { %v2930_v41 = vpop.f32.mrb[7].mxu0  ;;  %v271_v62 = vadd.f32 %v2928_v40, %v2898_v18 }
 0x123   :  { %v266_v37 = vadd.f32 %v2898_v18, %v2930_v41  ;;  %v1072_v41 = vld [vmem:[%s2770_s24] sm:$0xff] }
 0x125   :  { %v2624_v25 = vpop.eup %2623 }
 0x126   :  { %2254 = vmatmul.mubr.msk.f32.vlgmr.msra.gmra.mrb[2].mxu1 %vm144_vm0, %v2624_v25  ;;  %v1067_v25 = vadd.f32 %v1066_v24, %v1062_v16  ;;  %v1254_v24 = vld [vmem:[%s3136_s0 + $0x8] sm:$0xff] }
 0x127   :  { %2487 = vmatpush3.bf16.msra.mxu1 %v2867_v9  ;;  %2275 = vmatprep.mubr.msk.f32.mxu1 %vm2703_vm1, %v2704_v14 }
 0x128   :  { %2488 = vmatprep.subr.bf16.mxu1 %v2702_v5  ;;  %v1068_v26 = vmax.f32 %v1067_v25, 1e-24  ;;  %v1249_v25 = vld [vmem:[%s3137_s5] sm:$0xff] }
 0x12b   :  { %2490 = vmatpush3.bf16.msra.mxu1 %v2876_v15 }
 0x12c   :  { %2497 = vmatprep.subr.bf16.mxu1 %v2702_v5 }
 0x1f9   :  { %v422_v32 = vpop.f32.mrb[2].mxu1 }
 0x1fa   :  { %v426_v33 = vadd.f32 %v422_v32, %v241_v31  ;;  %v2255_v34 = vpop.f32.mrb[3].mxu1  ;;  %v2528_v31 = vpack.c.bf16 %v1077_v30, %v1076_v29  ;;  %v1255_v29 = vld [vmem:[%s3136_s0 + $0x10] sm:$0xff]  ;;  %v1256_v30 = vld [vmem:[%s3136_s0 + $0x18] sm:$0xff] }
 0x1fb   :  { %v1079_v34 = vld [vmem:[%s2775_s30 + $0x18] sm:$0xff] }
 0x1fc   :  { %2625 = vtanh.f32 %v426_v33  ;;  %v1078_v33 = vld [vmem:[%s2775_s30 + $0x10] sm:$0xff] }
 0x206   :  { %v2626_v35 = vpop.eup %2625 }
 0x207   :  { %2265 = vmatmul.mubr.msk.f32.vlgmr.msra.gmra.mrb[8].mxu0 %vm144_vm0, %v2626_v35  ;;  %v2531_v35 = vpack.c.bf16 %v1079_v34, %v1078_v33  ;;  %v1252_v33 = vld [vmem:[%s3137_s5 + $0x18] sm:$0xff] }
 0x208   :  { %2493 = vmatpush3.bf16.msra.mxu0 %v2867_v9  ;;  %2286 = vmatprep.mubr.msk.f32.mxu0 %vm2703_vm1, %v2704_v14 }
 0x209   :  { %2494 = vmatprep.subr.bf16.mxu0 %v2702_v5 }
 0x20c   :  { %2496 = vmatpush3.bf16.msra.mxu0 %v2876_v15 }
 0x20d   :  { %2503 = vmatprep.subr.bf16.mxu0 %v2702_v5 }
 0x2da   :  { %v497_v43 = vpop.f32.mrb[8].mxu0 }
 0x2db   :  { %v501_v44 = vadd.f32 %v497_v43, %v246_v42  ;;  %v2266_v45 = vpop.f32.mrb[9].mxu0  ;;  %v893_v43 = vld [vmem:[%s2755_s8] sm:$0xff] }
 0x2dd   :  { %2627 = vtanh.f32 %v501_v44  ;;  %v894_v44 = vld [vmem:[%s2755_s8 + $0x8] sm:$0xff] }
 0x2de   :  { %v2522_v45 = vpack.c.bf16 %v894_v44, %v893_v43  ;;  %v1510_v44 = vld [vmem:[%s3138_s9] sm:$0xff] }
 0x2e7   :  { %v2628_v46 = vpop.eup %2627 }
 0x2e8   :  { %2276 = vmatmul.mubr.msk.f32.vlgmr.msra.gmra.mrb[4].mxu1 %vm144_vm0, %v2628_v46  ;;  %v895_v46 = vld [vmem:[%s2755_s8 + $0x10] sm:$0xff] }
 0x2e9   :  { %2499 = vmatpush3.bf16.msra.mxu1 %v2867_v9  ;;  %2297 = vmatprep.mubr.msk.f32.mxu1 %vm2703_vm1, %v2704_v14 }
 0x2ea   :  { %2500 = vmatprep.subr.bf16.mxu1 %v2702_v5 }
 0x2ed   :  { %2502 = vmatpush3.bf16.msra.mxu1 %v2876_v15 }
 0x2ee   :  { %2509 = vmatprep.subr.bf16.mxu1 %v2702_v5 }
 0x3bb   :  { %v572_v48 = vpop.f32.mrb[4].mxu1 }
 0x3bc   :  { %v576_v49 = vadd.f32 %v572_v48, %v251_v47  ;;  %v2277_v50 = vpop.f32.mrb[5].mxu1  ;;  %v896_v47 = vld [vmem:[%s2755_s8 + $0x18] sm:$0xff]  ;;  %s3145_s8 = sld [smem:[#allocation15_spill]] }
 0x3bd   :  { %v1073_v50 = vld [vmem:[%s2770_s24 + $0x8] sm:$0xff] }
 0x3be   :  { %2629 = vtanh.f32 %v576_v49  ;;  %v2525_v49 = vpack.c.bf16 %v896_v47, %v895_v46 }
 0x3c8   :  { %v2630_v51 = vpop.eup %2629 }
 0x3c9   :  { %2287 = vmatmul.mubr.msk.f32.vlgmr.msra.gmra.mrb[10].mxu0 %vm144_vm0, %v2630_v51  ;;  %v2534_v51 = vpack.c.bf16 %v1073_v50, %v1072_v41  ;;  %v1512_v41 = vld [vmem:[%s3138_s9 + $0x10] sm:$0xff]  ;;  %v1513_v50 = vld [vmem:[%s3138_s9 + $0x18] sm:$0xff] }
 0x3ca   :  { %2505 = vmatpush3.bf16.msra.mxu0 %v2867_v9  ;;  %2308 = vmatprep.mubr.msk.f32.mxu0 %vm2703_vm1, %v2704_v14 }
 0x3cb   :  { %2506 = vmatprep.subr.bf16.mxu0 %v2702_v5 }
 0x3ce   :  { %2508 = vmatpush3.bf16.msra.mxu0 %v2876_v15 }
 0x3cf   :  { %2515 = vmatprep.subr.bf16.mxu0 %v2702_v5 }
 0x49c   :  { %v647_v53 = vpop.f32.mrb[10].mxu0 }
 0x49d   :  { %v651_v54 = vadd.f32 %v647_v53, %v256_v52  ;;  %v2288_v55 = vpop.f32.mrb[11].mxu0  ;;  %v1074_v53 = vld [vmem:[%s2770_s24 + $0x10] sm:$0xff] }
 0x49f   :  { %2631 = vtanh.f32 %v651_v54  ;;  %v1075_v54 = vld [vmem:[%s2770_s24 + $0x18] sm:$0xff]  ;;  %s2706_s24 = smov [#allocation3]  }
 0x4a0   :  { %v2537_v55 = vpack.c.bf16 %v1075_v54, %v1074_v53  ;;  %v1413_v54 = vld [vmem:[%s3139_s13] sm:$0xff]  ;;  %s2026_s30 = sshll.u32 %s2706_s24, 4  ;;  %s2027_s30 = int_to_ptr.vmem [resolvable:$true] %s2026_s30 }
 0x4a1   :  { %s2649_s6 = scalar_lea.vmem %s2027_s30, 16  ;;  %p2654_p1 = scmp.lt.s32.totalorder %s2027_s30, %s2027_s30 }
 0x4a2   :  { %p2650_p0 = scmp.ne.s32.totalorder %s2027_s30, %s2649_s6 }
 0x4a9   :  { %v2632_v56 = vpop.eup %2631 }
 0x4aa   :  { %2298 = vmatmul.mubr.msk.f32.vlgmr.msra.gmra.mrb[6].mxu1 %vm144_vm0, %v2632_v56 }
 0x4ab   :  { %2511 = vmatpush3.bf16.msra.mxu1 %v2867_v9  ;;  %2319 = vmatprep.mubr.msk.f32.mxu1 %vm2703_vm1, %v2704_v14 }
 0x4ac   :  { %2512 = vmatprep.subr.bf16.mxu1 %v2702_v5 }
 0x4af   :  { %2514 = vmatpush3.bf16.msra.mxu1 %v2876_v15  ;;  %v889_v15 = vmax.f32 %v888_v13, 1e-24 }
 0x4b0   :  { %2521 = vmatprep.subr.bf16.mxu1 %v2702_v5 }
 0x57d   :  { %v722_v7 = vpop.f32.mrb[6].mxu1 }
 0x57e   :  { %v726_v8 = vadd.f32 %v722_v7, %v261_v6  ;;  %v2299_v9 = vpop.f32.mrb[7].mxu1 }
 0x580   :  { %2633 = vtanh.f32 %v726_v8 }
 0x581   :  { %2635 = vrsqrt.f32 %v889_v15 }
 0x582   :  { %2637 = vrsqrt.f32 %v1068_v26 }
 0x58a   :  { %v2634_v10 = vpop.eup %2633 }
 0x58b   :  { %2309 = vmatmul.mubr.msk.f32.vlgmr.msra.gmra.mrb[12].mxu0 %vm144_vm0, %v2634_v10  ;;  %v2636_v27 = vpop.eup %2635 }
 0x58c   :  { %2330 = vmatprep.mubr.msk.f32.mxu0 %vm2703_vm1, %v2704_v14  ;;  %2517 = vmatpush3.bf16.msra.mxu0 %v2516_v21  ;;  %v892_v28 = vmul.f32 %v2636_v27, %v879_v58  ;;  %v2638_v32 = vpop.eup %2637  ;;  %v891_v52 = vmul.f32 %v2636_v27, %v2957_v57  ;;  %v1250_v27 = vld [vmem:[%s3137_s5 + $0x8] sm:$0xff] }
 0x58d   :  { %2518 = vmatprep.subr.bf16.mxu0 %v2702_v5  ;;  %v1071_v36 = vmul.f32 %v2638_v32, %v1058_v63  ;;  %v1070_v56 = vmul.f32 %v2638_v32, %v2961_v59  ;;  %v2543_v32 = vpack.c.bf16 %v1256_v30, %v1255_v29 }
 0x590   :  { %2520 = vmatpush3.bf16.msra.mxu0 %v2519_v23  ;;  %v1253_v23 = vld [vmem:[%s3136_s0] sm:$0xff] }
 0x591   :  { %2527 = vmatprep.subr.bf16.mxu0 %v2702_v5  ;;  %v2540_v26 = vpack.c.bf16 %v1254_v24, %v1253_v23 }
 0x593   :  { %2331 = vmatmul.mubr.msk.f32.vlgmr.msra.gmra.mrb[14].mxu0 %vm144_vm0, %v892_v28  ;;  %v2546_v28 = vpack.c.bf16 %v1250_v27, %v1249_v25 }
 0x594   :  { %2352 = vmatprep.mubr.msk.f32.mxu0 %vm2703_vm1, %v2704_v14  ;;  %2529 = vmatpush3.bf16.msra.mxu0 %v2528_v31  ;;  %v1251_v31 = vld [vmem:[%s3137_s5 + $0x10] sm:$0xff] }
 0x595   :  { %2530 = vmatprep.subr.bf16.mxu0 %v2702_v5  ;;  %v2549_v34 = vpack.c.bf16 %v1252_v33, %v1251_v31 }
 0x598   :  { %2532 = vmatpush3.bf16.msra.mxu0 %v2531_v35 }
 0x599   :  { %2539 = vmatprep.subr.bf16.mxu0 %v2702_v5 }
 0x59b   :  { %2353 = vmatmul.mubr.msk.f32.vlgmr.msra.gmra.mrb[16].mxu0 %vm144_vm0, %v1071_v36 }
 0x59c   :  { %2374 = vmatprep.mubr.msk.f32.mxu0 %vm2703_vm1, %v2704_v14  ;;  %2541 = vmatpush3.bf16.msra.mxu0 %v2540_v26 }
 0x59d   :  { %2542 = vmatprep.subr.bf16.mxu0 %v2702_v5 }
 0x5a0   :  { %2544 = vmatpush3.bf16.msra.mxu0 %v2543_v32 }
 0x5a1   :  { %2551 = vmatprep.subr.bf16.mxu0 %v2702_v5 }
 0x65e   :  { %v797_v38 = vpop.f32.mrb[12].mxu0 }
 0x65f   :  { %v801_v39 = vadd.f32 %v797_v38, %v266_v37  ;;  %v2310_v42 = vpop.f32.mrb[13].mxu0 }
 0x661   :  { %2639 = vtanh.f32 %v801_v39 }
 0x666   :  { %v970_v57 = vpop.f32.mrb[14].mxu0 }
 0x667   :  { %v2332_v58 = vpop.f32.mrb[15].mxu0 }
 0x668   :  { %v1416_v58 = vld [vmem:[%s3139_s13 + $0x18] sm:$0xff] }
 0x66b   :  { %v2640_v48 = vpop.eup %2639 }
 0x66c   :  { %2320 = vmatmul.mubr.msk.f32.vlgmr.msra.gmra.mrb[8].mxu1 %vm144_vm0, %v2640_v48 }
 0x66d   :  { %2523 = vmatpush3.bf16.msra.mxu1 %v2522_v45  ;;  %2341 = vmatprep.mubr.msk.f32.mxu1 %vm2703_vm1, %v2704_v14  ;;  %v1511_v45 = vld [vmem:[%s3138_s9 + $0x8] sm:$0xff] }
 0x66e   :  { %2524 = vmatprep.subr.bf16.mxu1 %v2702_v5  ;;  %v1149_v60 = vpop.f32.mrb[16].mxu0  ;;  %v2558_v47 = vpack.c.bf16 %v1511_v45, %v1510_v44  ;;  %v1767_v44 = vld [vmem:[%s3147_s19] sm:$0xff] }
 0x66f   :  { %v2354_v61 = vpop.f32.mrb[17].mxu0 }
 0x671   :  { %2526 = vmatpush3.bf16.msra.mxu1 %v2525_v49 }
 0x672   :  { %2533 = vmatprep.subr.bf16.mxu1 %v2702_v5 }
 0x674   :  { %2342 = vmatmul.mubr.msk.f32.vlgmr.msra.gmra.mrb[10].mxu1 %vm144_vm0, %v891_v52 }
 0x675   :  { %2535 = vmatpush3.bf16.msra.mxu1 %v2534_v51  ;;  %2363 = vmatprep.mubr.msk.f32.mxu1 %vm2703_vm1, %v2704_v14  ;;  %v2561_v51 = vpack.c.bf16 %v1513_v50, %v1512_v41  ;;  %v1769_v41 = vld [vmem:[%s3147_s19 + $0x10] sm:$0xff]  ;;  %v1770_v50 = vld [vmem:[%s3147_s19 + $0x18] sm:$0xff] }
 0x676   :  { %2536 = vmatprep.subr.bf16.mxu1 %v2702_v5 }
 0x679   :  { %2538 = vmatpush3.bf16.msra.mxu1 %v2537_v55  ;;  %v1414_v55 = vld [vmem:[%s3139_s13 + $0x8] sm:$0xff] }
 0x67a   :  { %2545 = vmatprep.subr.bf16.mxu1 %v2702_v5 }
 0x67c   :  { %2364 = vmatmul.mubr.msk.f32.vlgmr.msra.gmra.mrb[12].mxu1 %vm144_vm0, %v1070_v56  ;;  %v2552_v56 = vpack.c.bf16 %v1414_v55, %v1413_v54 }
 0x67d   :  { %2385 = vmatprep.mubr.msk.f32.mxu1 %vm2703_vm1, %v2704_v14  ;;  %2547 = vmatpush3.bf16.msra.mxu1 %v2546_v28  ;;  %v2092_v28 = vld [vmem:[%s3144_s3] ss:$0 sm:$0xff] }
 0x67e   :  { %2548 = vmatprep.subr.bf16.mxu1 %v2702_v5 }
 0x681   :  { %2550 = vmatpush3.bf16.msra.mxu1 %v2549_v34  ;;  %v2093_v34 = vld [vmem:[%s3145_s8] ss:$0 sm:$0xff] }
 0x682   :  { %2557 = vmatprep.subr.bf16.mxu1 %v2702_v5 }
 0x73f   :  { %v872_v63 = vpop.f32.mrb[8].mxu1 }
 0x740   :  { %v876_v0 = vadd.f32 %v872_v63, %v271_v62  ;;  %v2321_v1 = vpop.f32.mrb[9].mxu1  ;;  %v2087_v63 = vld [vmem:[%s3140_s17] ss:$0 sm:$0xff] }
 0x742   :  { %2641 = vtanh.f32 %v876_v0 }
 0x747   :  { %v1043_v59 = vpop.f32.mrb[10].mxu1 }
 0x748   :  { %v1044_v3 = vadd.f32 %v1043_v59, %v970_v57  ;;  %v2343_v4 = vpop.f32.mrb[11].mxu1  ;;  %v1415_v57 = vld [vmem:[%s3139_s13 + $0x10] sm:$0xff] }
 0x749   :  { %v1507_v4 = vld [vmem:[%s3141_s21 + $0x8] sm:$0xff] }
 0x74a   :  { %v1054_v6 = vadd.f32 %v2081_v2, %v1044_v3  ;;  %v1506_v3 = vld [vmem:[%s3141_s21] sm:$0xff] }
 0x74c   :  { %v2642_v7 = vpop.eup %2641  ;;  %v1055_v8 = vmul.f32 0.01, %v1054_v6 }
 0x74d   :  { %v1240_v9 = vmul.f32 %v2642_v7, %v2642_v7 }
 0x74e   :  { %v3022_v10 = vmax.f32 %v1054_v6, %v1055_v8 }
 0x74f   :  { %v1222_v11 = vpop.f32.mrb[12].mxu1  ;;  %v1241_v18 = vsel %vm144_vm0, %v1240_v9, 0.0  ;;  %v1508_v9 = vld [vmem:[%s3141_s21 + $0x10] sm:$0xff] }
 0x750   :  { %v1223_v40 = vadd.f32 %v1222_v11, %v1149_v60  ;;  %1242 = vadd.xlane.f32.xlu1 %v1241_v18  ;;  %v1236_v13 = vmul.f32 %v3022_v10, %v3022_v10  ;;  %v2365_v15 = vpop.f32.mrb[13].mxu1  ;;  %v2555_v60 = vpack.c.bf16 %v1416_v58, %v1415_v57  ;;  %v1509_v11 = vld [vmem:[%s3141_s21 + $0x18] sm:$0xff] }
 0x751   :  { %v1670_v15 = vld [vmem:[%s3142_s25] sm:$0xff] }
 0x752   :  { %v1233_v16 = vadd.f32 %v2084_v12, %v1223_v40  ;;  %v1237_v17 = vsel %vm144_vm0, %v1236_v13, 0.0  ;;  %v2567_v40 = vpack.c.bf16 %v1509_v11, %v1508_v9 }
 0x753   :  { %1238 = vadd.xlane.f32.xlu0 %v1237_v17 }
 0x754   :  { %v1234_v19 = vmul.f32 0.01, %v1233_v16 }
 0x756   :  { %v1235_v20 = vmax.f32 %v1233_v16, %v1234_v19  ;;  %v1671_v16 = vld [vmem:[%s3142_s25 + $0x8] sm:$0xff]  ;;  %v1672_v19 = vld [vmem:[%s3142_s25 + $0x10] sm:$0xff] }
 0x757   :  { %v2570_v17 = vpack.c.bf16 %v1671_v16, %v1670_v15 }
 0x758   :  { %v1497_v21 = vmul.f32 %v1235_v20, %v1235_v20 }
 0x75a   :  { %v1498_v22 = vsel %vm144_vm0, %v1497_v21, 0.0 }
 0x75b   :  { %1499 = vadd.xlane.f32.xlu0 %v1498_v22 }
 0x7dd   :  { %v1243_v35 = vpop.xlane.xlu1 %1242 }
 0x7e0   :  { %v1239_v36 = vpop.xlane.xlu0 %1238 }
 0x7e1   :  { %v1244_v37 = vadd.f32 %v1243_v35, %v1239_v36 }
 0x7e3   :  { %v1245_v38 = vmax.f32 %v1244_v37, 1e-24 }
 0x7e5   :  { %2643 = vrsqrt.f32 %v1245_v38 }
 0x7e8   :  { %v1500_v39 = vpop.xlane.xlu0 %1499 }
 0x7e9   :  { %v1501_v42 = vadd.f32 %v1500_v39, %v1239_v36 }
 0x7eb   :  { %v1502_v43 = vmax.f32 %v1501_v42, 1e-24  ;;  %v1771_v42 = vld [vmem:[%s3146_s14] sm:$0xff] }
 0x7ed   :  { %2645 = vrsqrt.f32 %v1502_v43  ;;  %v1772_v43 = vld [vmem:[%s3146_s14 + $0x8] sm:$0xff] }
 0x7ee   :  { %v2576_v45 = vpack.c.bf16 %v1772_v43, %v1771_v42 }
 0x7ef   :  { %v2644_v46 = vpop.eup %2643 }
 0x7f0   :  { %v1248_v48 = vmul.f32 %v2644_v46, %v2642_v7  ;;  %v1247_v49 = vmul.f32 %v2644_v46, %v3022_v10  ;;  %v2564_v7 = vpack.c.bf16 %v1507_v4, %v1506_v3  ;;  %v1768_v46 = vld [vmem:[%s3147_s19 + $0x8] sm:$0xff] }
 0x7f2   :  { %2375 = vmatmul.mubr.msk.f32.vlgmr.msra.gmra.mrb[18].mxu0 %vm144_vm0, %v1248_v48  ;;  %2386 = vmatmul.mubr.msk.f32.vlgmr.msra.gmra.mrb[14].mxu1 %vm144_vm0, %v1247_v49  ;;  %v1774_v48 = vld [vmem:[%s3146_s14 + $0x18] sm:$0xff]  ;;  %v2582_v49 = vpack.c.bf16 %v1768_v46, %v1767_v44 }
 0x7f3   :  { %2559 = vmatpush3.bf16.msra.mxu1 %v2558_v47  ;;  %2407 = vmatprep.mubr.msk.f32.mxu1 %vm2703_vm1, %v2704_v14  ;;  %v1773_v47 = vld [vmem:[%s3146_s14 + $0x10] sm:$0xff] }
 0x7f4   :  { %2560 = vmatprep.subr.bf16.mxu1 %v2702_v5  ;;  %2396 = vmatprep.mubr.msk.f32.mxu0 %vm2703_vm1, %v2704_v14 }
 0x7f5   :  { %2553 = vmatpush3.bf16.msra.mxu0 %v2552_v56 }
 0x7f6   :  { %2554 = vmatprep.subr.bf16.mxu0 %v2702_v5 }
 0x7f7   :  { %v2646_v52 = vpop.eup %2645  ;;  %2562 = vmatpush3.bf16.msra.mxu1 %v2561_v51  ;;  %v2579_v51 = vpack.c.bf16 %v1774_v48, %v1773_v47 }
 0x7f8   :  { %v1505_v53 = vmul.f32 %v2646_v52, %v1235_v20  ;;  %2569 = vmatprep.subr.bf16.mxu1 %v2702_v5  ;;  %v1504_v13 = vmul.f32 %v2646_v52, %v3022_v10  ;;  %v1673_v20 = vld [vmem:[%s3142_s25 + $0x18] sm:$0xff]  ;;  %v2088_v10 = vld [vmem:[%s3143_s29] ss:$0 sm:$0xff]  ;;  %v2585_v52 = vpack.c.bf16 %v1770_v50, %v1769_v41 }
 0x7f9   :  { %2556 = vmatpush3.bf16.msra.mxu0 %v2555_v60  ;;  %v2573_v21 = vpack.c.bf16 %v1673_v20, %v1672_v19 }
 0x7fa   :  { %2408 = vmatmul.mubr.msk.f32.vlgmr.msra.gmra.mrb[16].mxu1 %vm144_vm0, %v1505_v53  ;;  %2563 = vmatprep.subr.bf16.mxu0 %v2702_v5 }
 0x7fb   :  { %2429 = vmatprep.mubr.msk.f32.mxu1 %vm2703_vm1, %v2704_v14  ;;  %2571 = vmatpush3.bf16.msra.mxu1 %v2570_v17 }
 0x7fc   :  { %2572 = vmatprep.subr.bf16.mxu1 %v2702_v5 }
 0x7ff   :  { %2574 = vmatpush3.bf16.msra.mxu1 %v2573_v21 }
 0x800   :  { %2581 = vmatprep.subr.bf16.mxu1 %v2702_v5 }
 0x8c5   :  { %v1326_v61 = vpop.f32.mrb[18].mxu0  ;;  %v1399_v62 = vpop.f32.mrb[14].mxu1 }
 0x8c6   :  { %v1400_v0 = vadd.f32 %v1399_v62, %v1326_v61  ;;  %v2376_v1 = vpop.f32.mrb[19].mxu0  ;;  %v2387_v59 = vpop.f32.mrb[15].mxu1  ;;  %v2705_v61 = vmov 0  }
 0x8c7   :  { %2621 = vset.pattern.permute.xlu1 %v2705_v61  ;;  %2622 = vset.pattern.permute.xlu0 %v2705_v61 }
 0x8c8   :  { %v1410_v2 = vadd.f32 %v2087_v63, %v1400_v0  ;;  %v2097_v0 = vld [vmem:[%s2845_s12] ss:$0 sm:$0xff]  ;;  %s2653_s12 = scalar_lea.vmem %s2027_s30, 32 }
 0x8c9   :  { %p2655_p2 = scmp.lt.s32.totalorder %s2653_s12, %s2649_s6 }
 0x8ca   :  { %v1411_v6 = vmul.f32 0.01, %v1410_v2 }
 0x8cb   :  { %p2656_p3 = por %p2655_p2, %p2654_p1 }
 0x8cc   :  { %v1412_v8 = vmax.f32 %v1410_v2, %v1411_v6 }
 0x8cd   :  { %v1583_v12 = vpop.f32.mrb[16].mxu1  ;;  %p2657_p4 = pnand %p2656_p3, %p2650_p0 }
 0x8ce   :  { %2397 = vmatmul.mubr.msk.f32.vlgmr.msra.gmra.mrb[20].mxu0 %vm144_vm0, %v1412_v8  ;;  %v2409_v18 = vpop.f32.mrb[17].mxu1 }
 0x8cf   :  { %2565 = vmatpush3.bf16.msra.mxu0 %v2564_v7  ;;  %2418 = vmatprep.mubr.msk.f32.mxu0 %vm2703_vm1, %v2704_v14  ;;  %v1931_v7 = vld [vmem:[%s2850_s20] sm:$0x1] }
 0x8d0   :  { %2566 = vmatprep.subr.bf16.mxu0 %v2702_v5 }
 0x8d3   :  { %2568 = vmatpush3.bf16.msra.mxu0 %v2567_v40 }
 0x8d4   :  { %2575 = vmatprep.subr.bf16.mxu0 %v2702_v5 }
 0x8d6   :  { %2419 = vmatmul.mubr.msk.f32.vlgmr.msra.gmra.mrb[22].mxu0 %vm144_vm0, %v1504_v13 }
 0x8d7   :  { %2440 = vmatprep.mubr.msk.f32.mxu0 %vm2703_vm1, %v2704_v14  ;;  %2577 = vmatpush3.bf16.msra.mxu0 %v2576_v45 }
 0x8d8   :  { %2578 = vmatprep.subr.bf16.mxu0 %v2702_v5 }
 0x8db   :  { %2580 = vmatpush3.bf16.msra.mxu0 %v2579_v51 }
 0x8dc   :  { %2454 = vmatprep.subr.mxu0 %v2704_v14 }
 0x9a1   :  { %v1493_v22 = vpop.f32.mrb[20].mxu0 }
 0x9a2   :  { %v1494_v23 = vadd.f32 %v2088_v10, %v1493_v22  ;;  %v2398_v24 = vpop.f32.mrb[21].mxu0 }
 0x9a4   :  { %v1754_v25 = vmul.f32 %v1494_v23, %v1494_v23 }
 0x9a6   :  { %v1755_v26 = vsel %vm144_vm0, %v1754_v25, 0.0 }
 0x9a7   :  { %1756 = vadd.xlane.f32.xlu1 %v1755_v26 }
 0x9a9   :  { %v1656_v27 = vpop.f32.mrb[22].mxu0 }
 0x9aa   :  { %v1657_v29 = vadd.f32 %v1656_v27, %v1583_v12  ;;  %v2420_v30 = vpop.f32.mrb[23].mxu0 }
 0x9ac   :  { %v1667_v31 = vadd.f32 %v2092_v28, %v1657_v29 }
 0x9ae   :  { %v1668_v32 = vmul.f32 0.01, %v1667_v31 }
 0x9b0   :  { %v1669_v33 = vmax.f32 %v1667_v31, %v1668_v32 }
 0x9b2   :  { %2430 = vmatmul.mubr.msk.f32.vlgmr.msra.gmra.mrb[18].mxu1 %vm144_vm0, %v1669_v33 }
 0x9b3   :  { %2451 = vmatprep.mubr.msk.f32.mxu1 %vm2703_vm1, %v2704_v14  ;;  %2583 = vmatpush3.bf16.msra.mxu1 %v2582_v49 }
 0x9b4   :  { %2584 = vmatprep.subr.bf16.mxu1 %v2702_v5  ;;  %v1932_v5 = vld [vmem:[#allocation2] sm:$0x1] }
 0x9b7   :  { %2586 = vmatpush3.bf16.msra.mxu1 %v2585_v52 }
 0x9b8   :  { %1935 = vperm.xlu1 %2621, %v1932_v5  }
 0xa34   :  { %v1757_v53 = vpop.xlane.xlu1 %1756 }
 0xa38   :  { %v1936_v11 = vpop.permute.xlu1 %1935 }
 0xa85   :  { %v1750_v35 = vpop.f32.mrb[18].mxu1 }
 0xa86   :  { %v1751_v36 = vadd.f32 %v2093_v34, %v1750_v35  ;;  %v2431_v37 = vpop.f32.mrb[19].mxu1 }
 0xa88   :  { %v1758_v38 = vmul.f32 %v1751_v36, %v1751_v36 }
 0xa8a   :  { %v1759_v39 = vsel %vm144_vm0, %v1758_v38, 0.0 }
 0xa8b   :  { %1760 = vadd.xlane.f32.xlu0 %v1759_v39 }
 0xb18   :  { %v1761_v54 = vpop.xlane.xlu0 %1760 }
 0xb19   :  { %v1762_v55 = vadd.f32 %v1761_v54, %v1757_v53 }
 0xb1b   :  { %v1763_v56 = vmax.f32 %v1762_v55, 1e-24 }
 0xb1d   :  { %2647 = vrsqrt.f32 %v1763_v56 }
 0xb27   :  { %v2648_v57 = vpop.eup %2647 }
 0xb28   :  { %v1766_v58 = vmul.f32 %v2648_v57, %v1751_v36  ;;  %v1765_v60 = vmul.f32 %v2648_v57, %v1494_v23 }
 0xb2a   :  { %2441 = vmatmul.mubr.msk.f32.vlgmr.msra.gmra.mrb[24].mxu0 %vm144_vm0, %v1766_v58  ;;  %2452 = vmatmul.mubr.msk.f32.vlgmr.msra.gmra.mrb[20].mxu1 %vm144_vm0, %v1765_v60 }
 0xb2b   :  { %2456 = vmatprep.mubr.msk.f32.mxu0 %vm2703_vm1, %v2704_v14  ;;  %v1938_v14 = vlaneseq }
 0xb2d   :  { %v1939_v8 = vshrl.u32 %v1938_v14, 7 }
 0xb2f   :  { %v1940_v9 = vsub.s32 0, %v1939_v8 }
 0xb31   :  { %v1941_v12 = vrot.slane %v1936_v11, %v1940_v9 }
 0xbfd   :  { %v1844_v62 = vpop.f32.mrb[24].mxu0  ;;  %v1917_v63 = vpop.f32.mrb[20].mxu1 }
 0xbfe   :  { %v1918_v1 = vadd.f32 %v1917_v63, %v1844_v62  ;;  %v2442_v59 = vpop.f32.mrb[25].mxu0  ;;  %v2453_v2 = vpop.f32.mrb[21].mxu1 }
 0xc00   :  { %v1928_v3 = vadd.f32 %v2097_v0, %v1918_v1 }
 0xc02   :  { %v1929_v4 = vmul.f32 0.01, %v1928_v3 }
 0xc04   :  { %v1930_v6 = vmax.f32 %v1928_v3, %v1929_v4 }
 0xc06   :  { %2455 = vmatpush3.xpose.msk.msra.mxu0 %vm144_vm0, %v1930_v6 }
 0xc09   :  { %2457 = vmatmul.mubr.msk.f32.vlgmr.msra.gmra.mrb[26].mxu0 %vm144_vm0, %v1931_v7 }
 0xcdc   :  { %v2014_v18 = vpop.f32.mrb[26].mxu0 }
 0xcdd   :  { %v2015_v40 = vadd.f32 %v2014_v18, %v1941_v12  ;;  %v2458_v13 = vpop.f32.mrb[27].mxu0 }
 0xcdf   :  { %2019 = vst.msk [vmem:[#allocation3] sm:$0x1] %vm2018_vm2, %v2015_v40 }
 0xce0   :  { %2660 = shalt.err (!%p2657_p4)
}
 0xce1   :  { %s2661_s20 = scalar_lea.hbm %s2858_s4, 16 }
 0xce2   :  { %p2662_p5 = scmp.ne.s32.totalorder %s2858_s4, %s2661_s20  ;;  %p2665_p6 = scmp.lt.u32.totalorder %s2661_s20, %s2858_s4 }
 0xce4   :  { %p2667_p7 = pnand %p2665_p6, %p2662_p5 }
 0xce6   :  { %2670 = shalt.err (!%p2667_p7)
}
 0xce7   :  { %2029 = dma.vmem_to_hbm [thread:$0]  %s2027_s30, 16, %s2858_s4, [#allocation4]  }
 0xce8   :  { %2671 = dma.done.wait [#allocation4], 16  }
 0xce9   :  { %2672 = vsyncadd [#allocation4], 4294967280 }
 0xcea   :  { %2033 = vsyncpa [#allocation4], 1 }

</bundles_post_ra>
